<compile_context>
chip_gen: v5e
topology: v5e:2x2
jax: 0.10.0
libtpu: 0.0.40
codegen_flags: <defaults>
</compile_context>

<pallas_src>
import functools

import jax
import jax.numpy as jnp
import numpy as np
from jax import lax
from jax.experimental import pallas as pl
from jax.experimental.pallas import tpu as pltpu

DILATIONS = (1, 3, 6)
KSIZE = 3
PAD_MAX = max(DILATIONS) * (KSIZE // 2)      # 6 rows of top zero padding
HALO = 16                                    # fixed bottom halo rows (>= 2*PAD_MAX)


def _offset(b, kh):
    return PAD_MAX + (kh - 1) * DILATIONS[b]


# The 9 (branch, kernel-row) taps hit only 7 distinct row offsets {0,3,5,6,7,9,12}.
# kh == 1 is offset PAD_MAX for every branch -> fused into one wide matmul; the
# remaining 6 taps are listed as (offset, branch, kh), sorted by offset.
_NONCENTER = tuple(sorted((_offset(b, kh), b, kh)
                          for b in range(len(DILATIONS)) for kh in (0, 2)))


def _dilated_block_kernel(x_lo_ref, x_halo_ref, wbc_ref, wbo_ref, d_ref,
                          bias_ref, b4_ref, o_ref, *, row_tile, l_mid):
    """One (batch, row-strip) step: 3 dilated 3x3 convs -> ReLU -> fused 1x1 conv."""
    nb = len(DILATIONS)

    # Row window for this strip plus its 16-row bottom halo: (row_tile + 16, L_in), bf16.
    window = jnp.concatenate([x_lo_ref[0], x_halo_ref[0]], axis=0)

    # Center taps (kh == 1) share row offset PAD_MAX across all branches: one matmul
    # with N = 3*L_mid (better MXU N fill, one row slice instead of three).
    center = jnp.dot(window[PAD_MAX:PAD_MAX + row_tile, :], wbc_ref[...],
                     preferred_element_type=jnp.float32)            # (TH, 3*L_mid) f32
    accs = [center[:, b * l_mid:(b + 1) * l_mid] for b in range(nb)]

    # Remaining 6 taps, grouped by their (distinct) row offsets.
    for idx, (off, b, _) in enumerate(_NONCENTER):
        accs[b] = accs[b] + jnp.dot(window[off:off + row_tile, :], wbo_ref[idx],
                                    preferred_element_type=jnp.float32)

    # Per branch: folded-BN bias -> ReLU -> fused (channel-concat + 1x1 conv) as a
    # block-diagonal matmul; the concat intermediate never exists.
    out_acc = None
    for b in range(nb):
        y = jnp.maximum(accs[b] + bias_ref[b], 0.0).astype(jnp.bfloat16)
        part = jnp.dot(y, d_ref[b], preferred_element_type=jnp.float32)
        out_acc = part if out_acc is None else out_acc + part

    o_ref[0] = (out_acc + b4_ref[...]).astype(o_ref.dtype)           # lane-dense store


def _default_row_tile():
    """MXU M-dim fill: 128 on v5e (128x128 MXUs), 256 on v6e/v7x (256x256 MXUs)."""
    try:
        kind = jax.devices()[0].device_kind.lower()
        if "v5 lite" in kind or "v5e" in kind:
            return 128
    except Exception:
        pass
    return 256


def _vmem_limit_bytes():
    """Generation-aware scoped-VMEM limit: 3/4 of physical, capped at 100 MiB."""
    try:
        cap = int(pltpu.get_tpu_info().vmem_capacity_bytes)
    except Exception:
        cap = 64 * 1024 * 1024          # conservative (v7x-sized) fallback
    return min((cap * 3) // 4, 100 * 1024 * 1024)


def _band_matrix(w_kh, dil, W):
    """Banded weights for one kernel row: (W*Cin, W*Cout).

    Out-of-range taps along W are simply omitted, so the conv's zero padding in W is
    encoded in the band and the input needs NO width padding."""
    mat = None
    for kw in range(KSIZE):
        shift = np.zeros((W, W), np.float32)
        for c in range(W):
            s = c + (kw - 1) * dil
            if 0 <= s < W:
                shift[s, c] = 1.0
        term = jnp.kron(jnp.asarray(shift), w_kh[kw])        # (W*Cin, W*Cout)
        mat = term if mat is None else mat + term
    return mat


def dilated_block_forward(x_nchw, params, *, eps=1e-5, row_tile=None):
    """Eval-mode DilatedBlock forward. Input/Output are NCHW (PyTorch convention)."""
    N, Cin, H, W = x_nchw.shape
    Cout = params["branches"][0]["conv_w"].shape[0]
    C5 = params["conv4_w"].shape[0]
    nb = len(DILATIONS)

    if row_tile is None:
        row_tile = _default_row_tile()
    # No point in strips taller than the (16-rounded) image height.
    row_tile = max(16, min(row_tile, ((H + 15) // 16) * 16))
    assert row_tile % 16 == 0, row_tile

    L_in = W * Cin                      # folded input lane width (no W padding)
    L_mid = W * Cout                    # folded per-branch activation lane width
    L_out = W * C5                      # folded output lane width

    # ---- fold eval-mode BN into each branch conv (weights * scale, fused bias) ----
    w_folds, bias_rows = [], []
    for p in params["branches"]:
        s = p["bn_gamma"] / jnp.sqrt(p["bn_var"] + eps)                    # (Cout,)
        w_hwio = jnp.transpose(p["conv_w"], (2, 3, 1, 0)).astype(jnp.float32)
        w_folds.append(w_hwio * s)                                         # (3,3,Cin,Cout)
        bias = (p["conv_b"] - p["bn_mean"]) * s + p["bn_beta"]             # (Cout,)
        bias_rows.append(jnp.tile(bias.astype(jnp.float32), W))            # (W*Cout,)
    biases = jnp.stack(bias_rows)[:, None, :]                              # (3,1,L_mid) f32

    # ---- banded 3x3 weights, packed by row offset (bf16 MXU operands) ----
    band = {}
    for b, dil in enumerate(DILATIONS):
        for kh in range(KSIZE):
            band[(b, kh)] = _band_matrix(w_folds[b][kh], dil, W)           # (L_in, L_mid)
    wbc = jnp.concatenate([band[(b, 1)] for b in range(nb)],
                          axis=1).astype(jnp.bfloat16)                     # (L_in, 3*L_mid)
    wbo = jnp.stack([band[(b, kh)] for (_, b, kh) in _NONCENTER]
                    ).astype(jnp.bfloat16)                                 # (6, L_in, L_mid)

    # ---- fused concat + 1x1 conv: block-diagonal (L_mid, L_out) matrix per branch ----
    w4 = params["conv4_w"][:, :, 0, 0]                                     # (C5, 3*Cout)
    eye_w = jnp.asarray(np.eye(W, dtype=np.float32))
    dmats = jnp.stack([
        jnp.kron(eye_w, jnp.transpose(w4[:, b * Cout:(b + 1) * Cout]).astype(jnp.float32))
        for b in range(nb)]).astype(jnp.bfloat16)                          # (3,L_mid,L_out)
    b4_row = jnp.tile(params["conv4_b"].astype(jnp.float32), W)[None, :]   # (1,L_out) f32

    # ---- input: NCHW -> NHWC, cast bf16 (halves DMA bytes), pad H only, fold W ----
    num_strips = pl.cdiv(H, row_tile)
    H_arr = num_strips * row_tile + HALO          # halo block of the last strip exists
    x = jnp.transpose(x_nchw, (0, 2, 3, 1)).astype(jnp.bfloat16)
    x = jnp.pad(x, ((0, 0), (PAD_MAX, H_arr - PAD_MAX - H), (0, 0), (0, 0)))
    x_fold = x.reshape(N, H_arr, L_in)
    # TODO(synk): the top/bottom halo could be zero-masked in-kernel (pl.when on
    # program_id(1)) to avoid this pad pass entirely for very large activations.

    Ho_arr = num_strips * row_tile
    vmem_limit = _vmem_limit_bytes()

    weight_bytes = 2 * (wbc.size + wbo.size + dmats.size)
    # Band matrices grow ~9*W^2*Cin*Cout; add W tiling before this assert trips.
    assert 2 * weight_bytes < vmem_limit, (weight_bytes, vmem_limit)

    flops = 2 * N * Ho_arr * (nb * KSIZE * L_in * L_mid + nb * L_mid * L_out)
    bytes_accessed = (2 * N * num_strips * (row_tile + HALO) * L_in
                      + 4 * N * Ho_arr * L_out
                      + weight_bytes + 4 * (biases.size + b4_row.size))

    def build_call(single_buffer_weights):
        pm = pl.Buffered(1) if single_buffer_weights else None

        def wspec(shape, imap):
            if pm is None:
                return pl.BlockSpec(shape, imap)
            return pl.BlockSpec(shape, imap, pipeline_mode=pm)

        halo_blocks = row_tile // HALO
        in_specs = [
            # this row strip + a fixed 16-row bottom halo block (covers offsets 0..12)
            pl.BlockSpec((1, row_tile, L_in), lambda n, i: (n, i, 0)),
            pl.BlockSpec((1, HALO, L_in), lambda n, i: (n, (i + 1) * halo_blocks, 0)),
            # constant-index weights/biases: fetched once, single-buffered when possible
            wspec((L_in, nb * L_mid), lambda n, i: (0, 0)),
            wspec((len(_NONCENTER), L_in, L_mid), lambda n, i: (0, 0, 0)),
            wspec((nb, L_mid, L_out), lambda n, i: (0, 0, 0)),
            wspec((nb, 1, L_mid), lambda n, i: (0, 0, 0)),
            wspec((1, L_out), lambda n, i: (0, 0)),
        ]
        return pl.pallas_call(
            functools.partial(_dilated_block_kernel, row_tile=row_tile, l_mid=L_mid),
            out_shape=jax.ShapeDtypeStruct((N, Ho_arr, L_out), jnp.float32),
            grid=(N, num_strips),
            in_specs=in_specs,
            out_specs=pl.BlockSpec((1, row_tile, L_out), lambda n, i: (n, i, 0)),
            compiler_params=pltpu.CompilerParams(
                dimension_semantics=("parallel", "parallel"),
                vmem_limit_bytes=int(vmem_limit)),
            cost_estimate=pl.CostEstimate(flops=int(flops), transcendentals=0,
                                          bytes_accessed=int(bytes_accessed)),
        )

    args = (x_fold, x_fold, wbc, wbo, dmats, biases, b4_row)
    try:
        out_fold = jax.block_until_ready(build_call(True)(*args))
    except Exception:
        # Some builds may reject Buffered(1); fall back to default double buffering.
        out_fold = build_call(False)(*args)

    out = out_fold[:, :H, :].reshape(N, H, W, C5)
    return jnp.transpose(out, (0, 3, 1, 2))      # NHWC -> NCHW (PyTorch convention)


def _reference_forward(x_nchw, params, *, eps=1e-5):
    """Pure-JAX reference (lax.conv, f32 HIGHEST) for a correctness check."""
    x = jnp.transpose(x_nchw, (0, 2, 3, 1)).astype(jnp.float32)
    feats = []
    for p, d in zip(params["branches"], DILATIONS):
        w = jnp.transpose(p["conv_w"], (2, 3, 1, 0)).astype(jnp.float32)
        y = lax.conv_general_dilated(
            x, w, window_strides=(1, 1), padding=[(d, d), (d, d)],
            rhs_dilation=(d, d), dimension_numbers=("NHWC", "HWIO", "NHWC"),
            precision=lax.Precision.HIGHEST)
        y = y + p["conv_b"]
        s = p["bn_gamma"] / jnp.sqrt(p["bn_var"] + eps)
        y = (y - p["bn_mean"]) * s + p["bn_beta"]
        feats.append(jnp.maximum(y, 0.0))
    cat = jnp.concatenate(feats, axis=-1)                                  # (N,H,W,3*Cout)
    w4 = params["conv4_w"][:, :, 0, 0]                                     # (C5, 3*Cout)
    out = jnp.einsum("nhwc,oc->nhwo", cat, w4,
                     precision=lax.Precision.HIGHEST) + params["conv4_b"]
    return jnp.transpose(out, (0, 3, 1, 2))


def _init_params(key, in_ch, out_ch):
    """Deterministic synthetic parameters matching DilatedBlock.__init__ shapes."""
    k_branches, k_conv4 = jax.random.split(key)
    branches = []
    fan_in = in_ch * KSIZE * KSIZE
    bound = 1.0 / jnp.sqrt(fan_in)
    for kb in jax.random.split(k_branches, len(DILATIONS)):
        k = jax.random.split(kb, 6)
        branches.append({
            "conv_w": jax.random.uniform(k[0], (out_ch, in_ch, KSIZE, KSIZE),
                                         jnp.float32, -bound, bound),
            "conv_b": jax.random.uniform(k[1], (out_ch,), jnp.float32, -bound, bound),
            "bn_gamma": 1.0 + 0.1 * jax.random.normal(k[2], (out_ch,), jnp.float32),
            "bn_beta": 0.1 * jax.random.normal(k[3], (out_ch,), jnp.float32),
            "bn_mean": 0.1 * jax.random.normal(k[4], (out_ch,), jnp.float32),
            "bn_var": jnp.abs(1.0 + 0.1 * jax.random.normal(k[5], (out_ch,), jnp.float32)),
        })
    fan4 = out_ch * len(DILATIONS)
    bound4 = 1.0 / jnp.sqrt(fan4)
    k4 = jax.random.split(k_conv4, 2)
    return {
        "branches": branches,
        "conv4_w": jax.random.uniform(k4[0], (out_ch, out_ch * len(DILATIONS), 1, 1),
                                      jnp.float32, -bound4, bound4),
        "conv4_b": jax.random.uniform(k4[1], (out_ch,), jnp.float32, -bound4, bound4),
    }


if __name__ == "__main__":
    key = jax.random.PRNGKey(0)
    in_ch, out_ch = 4, 8
    N, H, W = 2, 16, 16

    k_x, k_p = jax.random.split(key)
    x = jax.random.normal(k_x, (N, in_ch, H, W), jnp.float32)   # NCHW like PyTorch
    params = _init_params(k_p, in_ch, out_ch)

    out = dilated_block_forward(x, params)
    out = jax.block_until_ready(out)

    ref = _reference_forward(x, params)
    assert out.shape == (N, out_ch, H, W), out.shape
    err = float(jnp.max(jnp.abs(out - ref)))
    # bf16 MXU operands vs. f32 HIGHEST reference: tolerance loosened deliberately.
    assert err < 5e-2, err

    print("KERNEL_OK")
</pallas_src>

<mosaic_0001>
module attributes {stable_mosaic.version = 11 : i64} {
  func.func @_dilated_block_kernel(%arg0: i32, %arg1: i32, %arg2: memref<1x16x64xbf16, #tpu.memory_space<vmem>>, %arg3: memref<1x16x64xbf16, #tpu.memory_space<vmem>>, %arg4: memref<64x384xbf16, #tpu.memory_space<vmem>>, %arg5: memref<6x64x128xbf16, #tpu.memory_space<vmem>>, %arg6: memref<3x128x128xbf16, #tpu.memory_space<vmem>>, %arg7: memref<3x1x128xf32, #tpu.memory_space<vmem>>, %arg8: memref<1x128xf32, #tpu.memory_space<vmem>>, %arg9: memref<1x16x128xf32, #tpu.memory_space<vmem>>) attributes {dimension_semantics = [#tpu.dimension_semantics<parallel>, #tpu.dimension_semantics<parallel>], iteration_bounds = array<i64: 2, 1>, scalar_prefetch = 0 : i64, scratch_operands = 0 : i64, tpu.core_type = #tpu.core_type<tc>, window_params = [{transform_indices = @transform_0, window_bounds = array<i64: 1, 16, 64>}, {transform_indices = @transform_1, window_bounds = array<i64: 1, 16, 64>}, {pipeline_mode = #tpu.pipeline_mode<synchronous>, transform_indices = @transform_2, window_bounds = array<i64: 64, 384>}, {pipeline_mode = #tpu.pipeline_mode<synchronous>, transform_indices = @transform_3, window_bounds = array<i64: 6, 64, 128>}, {pipeline_mode = #tpu.pipeline_mode<synchronous>, transform_indices = @transform_4, window_bounds = array<i64: 3, 128, 128>}, {pipeline_mode = #tpu.pipeline_mode<synchronous>, transform_indices = @transform_5, window_bounds = array<i64: 3, 1, 128>}, {pipeline_mode = #tpu.pipeline_mode<synchronous>, transform_indices = @transform_6, window_bounds = array<i64: 1, 128>}, {transform_indices = @transform_7, window_bounds = array<i64: 1, 16, 128>}]} {
    %c0 = arith.constant 0 : index
    %c0_0 = arith.constant 0 : index
    %c0_1 = arith.constant 0 : index
    %0 = vector.load %arg2[%c0, %c0_0, %c0_1] : memref<1x16x64xbf16, #tpu.memory_space<vmem>>, vector<1x16x64xbf16>
    %1 = vector.shape_cast %0 : vector<1x16x64xbf16> to vector<16x64xbf16>
    %c0_2 = arith.constant 0 : index
    %c0_3 = arith.constant 0 : index
    %c0_4 = arith.constant 0 : index
    %2 = vector.load %arg3[%c0_2, %c0_3, %c0_4] : memref<1x16x64xbf16, #tpu.memory_space<vmem>>, vector<1x16x64xbf16>
    %3 = vector.shape_cast %2 : vector<1x16x64xbf16> to vector<16x64xbf16>
    %4 = tpu.concatenate %1, %3 in 0 : vector<16x64xbf16>, vector<16x64xbf16> -> vector<32x64xbf16>
    %5 = vector.extract_strided_slice %4 {offsets = [6, 0], sizes = [16, 64], strides = [1, 1]} : vector<32x64xbf16> to vector<16x64xbf16>
    %c0_5 = arith.constant 0 : index
    %c0_6 = arith.constant 0 : index
    %6 = vector.load %arg4[%c0_5, %c0_6] : memref<64x384xbf16, #tpu.memory_space<vmem>>, vector<64x384xbf16>
    %cst = arith.constant dense<0.000000e+00> : vector<16x384xf32>
    %7 = tpu.matmul %5, %6, %cst {dimension_numbers = #tpu.dot_dimension_numbers<[1], [0], [0], [1], [0, 0, 1, 1], [], []>} : vector<16x64xbf16>, vector<64x384xbf16>, vector<16x384xf32> -> vector<16x384xf32>
    %8 = vector.extract_strided_slice %7 {offsets = [0, 0], sizes = [16, 128], strides = [1, 1]} : vector<16x384xf32> to vector<16x128xf32>
    %9 = vector.extract_strided_slice %7 {offsets = [0, 128], sizes = [16, 128], strides = [1, 1]} : vector<16x384xf32> to vector<16x128xf32>
    %10 = vector.extract_strided_slice %7 {offsets = [0, 256], sizes = [16, 128], strides = [1, 1]} : vector<16x384xf32> to vector<16x128xf32>
    %11 = vector.extract_strided_slice %4 {offsets = [0, 0], sizes = [16, 64], strides = [1, 1]} : vector<32x64xbf16> to vector<16x64xbf16>
    %c0_7 = arith.constant 0 : index
    %c0_8 = arith.constant 0 : index
    %c0_9 = arith.constant 0 : index
    %12 = vector.load %arg5[%c0_7, %c0_8, %c0_9] : memref<6x64x128xbf16, #tpu.memory_space<vmem>>, vector<1x64x128xbf16>
    %13 = vector.shape_cast %12 : vector<1x64x128xbf16> to vector<64x128xbf16>
    %cst_10 = arith.constant dense<0.000000e+00> : vector<16x128xf32>
    %14 = tpu.matmul %11, %13, %cst_10 {dimension_numbers = #tpu.dot_dimension_numbers<[1], [0], [0], [1], [0, 0, 1, 1], [], []>} : vector<16x64xbf16>, vector<64x128xbf16>, vector<16x128xf32> -> vector<16x128xf32>
    %15 = arith.addf %10, %14 : vector<16x128xf32>
    %16 = vector.extract_strided_slice %4 {offsets = [3, 0], sizes = [16, 64], strides = [1, 1]} : vector<32x64xbf16> to vector<16x64xbf16>
    %c1 = arith.constant 1 : index
    %c0_11 = arith.constant 0 : index
    %c0_12 = arith.constant 0 : index
    %17 = vector.load %arg5[%c1, %c0_11, %c0_12] : memref<6x64x128xbf16, #tpu.memory_space<vmem>>, vector<1x64x128xbf16>
    %18 = vector.shape_cast %17 : vector<1x64x128xbf16> to vector<64x128xbf16>
    %cst_13 = arith.constant dense<0.000000e+00> : vector<16x128xf32>
    %19 = tpu.matmul %16, %18, %cst_13 {dimension_numbers = #tpu.dot_dimension_numbers<[1], [0], [0], [1], [0, 0, 1, 1], [], []>} : vector<16x64xbf16>, vector<64x128xbf16>, vector<16x128xf32> -> vector<16x128xf32>
    %20 = arith.addf %9, %19 : vector<16x128xf32>
    %21 = vector.extract_strided_slice %4 {offsets = [5, 0], sizes = [16, 64], strides = [1, 1]} : vector<32x64xbf16> to vector<16x64xbf16>
    %c2 = arith.constant 2 : index
    %c0_14 = arith.constant 0 : index
    %c0_15 = arith.constant 0 : index
    %22 = vector.load %arg5[%c2, %c0_14, %c0_15] : memref<6x64x128xbf16, #tpu.memory_space<vmem>>, vector<1x64x128xbf16>
    %23 = vector.shape_cast %22 : vector<1x64x128xbf16> to vector<64x128xbf16>
    %cst_16 = arith.constant dense<0.000000e+00> : vector<16x128xf32>
    %24 = tpu.matmul %21, %23, %cst_16 {dimension_numbers = #tpu.dot_dimension_numbers<[1], [0], [0], [1], [0, 0, 1, 1], [], []>} : vector<16x64xbf16>, vector<64x128xbf16>, vector<16x128xf32> -> vector<16x128xf32>
    %25 = arith.addf %8, %24 : vector<16x128xf32>
    %26 = vector.extract_strided_slice %4 {offsets = [7, 0], sizes = [16, 64], strides = [1, 1]} : vector<32x64xbf16> to vector<16x64xbf16>
    %c3 = arith.constant 3 : index
    %c0_17 = arith.constant 0 : index
    %c0_18 = arith.constant 0 : index
    %27 = vector.load %arg5[%c3, %c0_17, %c0_18] : memref<6x64x128xbf16, #tpu.memory_space<vmem>>, vector<1x64x128xbf16>
    %28 = vector.shape_cast %27 : vector<1x64x128xbf16> to vector<64x128xbf16>
    %cst_19 = arith.constant dense<0.000000e+00> : vector<16x128xf32>
    %29 = tpu.matmul %26, %28, %cst_19 {dimension_numbers = #tpu.dot_dimension_numbers<[1], [0], [0], [1], [0, 0, 1, 1], [], []>} : vector<16x64xbf16>, vector<64x128xbf16>, vector<16x128xf32> -> vector<16x128xf32>
    %30 = arith.addf %25, %29 : vector<16x128xf32>
    %31 = vector.extract_strided_slice %4 {offsets = [9, 0], sizes = [16, 64], strides = [1, 1]} : vector<32x64xbf16> to vector<16x64xbf16>
    %c4 = arith.constant 4 : index
    %c0_20 = arith.constant 0 : index
    %c0_21 = arith.constant 0 : index
    %32 = vector.load %arg5[%c4, %c0_20, %c0_21] : memref<6x64x128xbf16, #tpu.memory_space<vmem>>, vector<1x64x128xbf16>
    %33 = vector.shape_cast %32 : vector<1x64x128xbf16> to vector<64x128xbf16>
    %cst_22 = arith.constant dense<0.000000e+00> : vector<16x128xf32>
    %34 = tpu.matmul %31, %33, %cst_22 {dimension_numbers = #tpu.dot_dimension_numbers<[1], [0], [0], [1], [0, 0, 1, 1], [], []>} : vector<16x64xbf16>, vector<64x128xbf16>, vector<16x128xf32> -> vector<16x128xf32>
    %35 = arith.addf %20, %34 : vector<16x128xf32>
    %36 = vector.extract_strided_slice %4 {offsets = [12, 0], sizes = [16, 64], strides = [1, 1]} : vector<32x64xbf16> to vector<16x64xbf16>
    %c5 = arith.constant 5 : index
    %c0_23 = arith.constant 0 : index
    %c0_24 = arith.constant 0 : index
    %37 = vector.load %arg5[%c5, %c0_23, %c0_24] : memref<6x64x128xbf16, #tpu.memory_space<vmem>>, vector<1x64x128xbf16>
    %38 = vector.shape_cast %37 : vector<1x64x128xbf16> to vector<64x128xbf16>
    %cst_25 = arith.constant dense<0.000000e+00> : vector<16x128xf32>
    %39 = tpu.matmul %36, %38, %cst_25 {dimension_numbers = #tpu.dot_dimension_numbers<[1], [0], [0], [1], [0, 0, 1, 1], [], []>} : vector<16x64xbf16>, vector<64x128xbf16>, vector<16x128xf32> -> vector<16x128xf32>
    %40 = arith.addf %15, %39 : vector<16x128xf32>
    %c0_26 = arith.constant 0 : index
    %c0_27 = arith.constant 0 : index
    %c0_28 = arith.constant 0 : index
    %41 = vector.load %arg7[%c0_26, %c0_27, %c0_28] : memref<3x1x128xf32, #tpu.memory_space<vmem>>, vector<1x1x128xf32>
    %42 = vector.shape_cast %41 : vector<1x1x128xf32> to vector<1x128xf32>
    %43 = vector.broadcast %42 : vector<1x128xf32> to vector<16x128xf32>
    %44 = arith.addf %30, %43 : vector<16x128xf32>
    %cst_29 = arith.constant 0.000000e+00 : f32
    %45 = vector.broadcast %cst_29 : f32 to vector<16x128xf32>
    %46 = arith.maximumf %44, %45 : vector<16x128xf32>
    %47 = arith.truncf %46 : vector<16x128xf32> to vector<16x128xbf16>
    %c0_30 = arith.constant 0 : index
    %c0_31 = arith.constant 0 : index
    %c0_32 = arith.constant 0 : index
    %48 = vector.load %arg6[%c0_30, %c0_31, %c0_32] : memref<3x128x128xbf16, #tpu.memory_space<vmem>>, vector<1x128x128xbf16>
    %49 = vector.shape_cast %48 : vector<1x128x128xbf16> to vector<128x128xbf16>
    %cst_33 = arith.constant dense<0.000000e+00> : vector<16x128xf32>
    %50 = tpu.matmul %47, %49, %cst_33 {dimension_numbers = #tpu.dot_dimension_numbers<[1], [0], [0], [1], [0, 0, 1, 1], [], []>} : vector<16x128xbf16>, vector<128x128xbf16>, vector<16x128xf32> -> vector<16x128xf32>
    %c1_34 = arith.constant 1 : index
    %c0_35 = arith.constant 0 : index
    %c0_36 = arith.constant 0 : index
    %51 = vector.load %arg7[%c1_34, %c0_35, %c0_36] : memref<3x1x128xf32, #tpu.memory_space<vmem>>, vector<1x1x128xf32>
    %52 = vector.shape_cast %51 : vector<1x1x128xf32> to vector<1x128xf32>
    %53 = vector.broadcast %52 : vector<1x128xf32> to vector<16x128xf32>
    %54 = arith.addf %35, %53 : vector<16x128xf32>
    %cst_37 = arith.constant 0.000000e+00 : f32
    %55 = vector.broadcast %cst_37 : f32 to vector<16x128xf32>
    %56 = arith.maximumf %54, %55 : vector<16x128xf32>
    %57 = arith.truncf %56 : vector<16x128xf32> to vector<16x128xbf16>
    %c1_38 = arith.constant 1 : index
    %c0_39 = arith.constant 0 : index
    %c0_40 = arith.constant 0 : index
    %58 = vector.load %arg6[%c1_38, %c0_39, %c0_40] : memref<3x128x128xbf16, #tpu.memory_space<vmem>>, vector<1x128x128xbf16>
    %59 = vector.shape_cast %58 : vector<1x128x128xbf16> to vector<128x128xbf16>
    %cst_41 = arith.constant dense<0.000000e+00> : vector<16x128xf32>
    %60 = tpu.matmul %57, %59, %cst_41 {dimension_numbers = #tpu.dot_dimension_numbers<[1], [0], [0], [1], [0, 0, 1, 1], [], []>} : vector<16x128xbf16>, vector<128x128xbf16>, vector<16x128xf32> -> vector<16x128xf32>
    %61 = arith.addf %50, %60 : vector<16x128xf32>
    %c2_42 = arith.constant 2 : index
    %c0_43 = arith.constant 0 : index
    %c0_44 = arith.constant 0 : index
    %62 = vector.load %arg7[%c2_42, %c0_43, %c0_44] : memref<3x1x128xf32, #tpu.memory_space<vmem>>, vector<1x1x128xf32>
    %63 = vector.shape_cast %62 : vector<1x1x128xf32> to vector<1x128xf32>
    %64 = vector.broadcast %63 : vector<1x128xf32> to vector<16x128xf32>
    %65 = arith.addf %40, %64 : vector<16x128xf32>
    %cst_45 = arith.constant 0.000000e+00 : f32
    %66 = vector.broadcast %cst_45 : f32 to vector<16x128xf32>
    %67 = arith.maximumf %65, %66 : vector<16x128xf32>
    %68 = arith.truncf %67 : vector<16x128xf32> to vector<16x128xbf16>
    %c2_46 = arith.constant 2 : index
    %c0_47 = arith.constant 0 : index
    %c0_48 = arith.constant 0 : index
    %69 = vector.load %arg6[%c2_46, %c0_47, %c0_48] : memref<3x128x128xbf16, #tpu.memory_space<vmem>>, vector<1x128x128xbf16>
    %70 = vector.shape_cast %69 : vector<1x128x128xbf16> to vector<128x128xbf16>
    %cst_49 = arith.constant dense<0.000000e+00> : vector<16x128xf32>
    %71 = tpu.matmul %68, %70, %cst_49 {dimension_numbers = #tpu.dot_dimension_numbers<[1], [0], [0], [1], [0, 0, 1, 1], [], []>} : vector<16x128xbf16>, vector<128x128xbf16>, vector<16x128xf32> -> vector<16x128xf32>
    %72 = arith.addf %61, %71 : vector<16x128xf32>
    %c0_50 = arith.constant 0 : index
    %c0_51 = arith.constant 0 : index
    %73 = vector.load %arg8[%c0_50, %c0_51] : memref<1x128xf32, #tpu.memory_space<vmem>>, vector<1x128xf32>
    %74 = vector.broadcast %73 : vector<1x128xf32> to vector<16x128xf32>
    %75 = arith.addf %72, %74 : vector<16x128xf32>
    %c0_52 = arith.constant 0 : index
    %c0_53 = arith.constant 0 : index
    %c0_54 = arith.constant 0 : index
    %76 = vector.load %arg9[%c0_52, %c0_53, %c0_54] : memref<1x16x128xf32, #tpu.memory_space<vmem>>, vector<1x16x128xf32>
    %77 = vector.shape_cast %76 : vector<1x16x128xf32> to vector<16x128xf32>
    %78 = vector.shape_cast %75 : vector<16x128xf32> to vector<1x16x128xf32>
    tpu.vector_store %arg9[%c0_52, %c0_53, %c0_54], %78 {strides = array<i32>} : memref<1x16x128xf32, #tpu.memory_space<vmem>>, vector<1x16x128xf32>,
    return
  }
  func.func @transform_0(%arg0: i32, %arg1: i32) -> (i32, i32, i32) {
    %c0_i32 = arith.constant 0 : i32
    %c0_i32_0 = arith.constant 0 : i32
    return %arg0, %arg1, %c0_i32 : i32, i32, i32
  }
  func.func @transform_1(%arg0: i32, %arg1: i32) -> (i32, i32, i32) {
    %c1_i32 = arith.constant 1 : i32
    %0 = arith.addi %arg1, %c1_i32 : i32
    %c1_i32_0 = arith.constant 1 : i32
    %1 = arith.muli %0, %c1_i32_0 : i32
    %c0_i32 = arith.constant 0 : i32
    %c0_i32_1 = arith.constant 0 : i32
    return %arg0, %1, %c0_i32 : i32, i32, i32
  }
  func.func @transform_2(%arg0: i32, %arg1: i32) -> (i32, i32) {
    %c0_i32 = arith.constant 0 : i32
    %c0_i32_0 = arith.constant 0 : i32
    %c0_i32_1 = arith.constant 0 : i32
    return %c0_i32, %c0_i32_0 : i32, i32
  }
  func.func @transform_3(%arg0: i32, %arg1: i32) -> (i32, i32, i32) {
    %c0_i32 = arith.constant 0 : i32
    %c0_i32_0 = arith.constant 0 : i32
    %c0_i32_1 = arith.constant 0 : i32
    %c0_i32_2 = arith.constant 0 : i32
    return %c0_i32, %c0_i32_0, %c0_i32_1 : i32, i32, i32
  }
  func.func @transform_4(%arg0: i32, %arg1: i32) -> (i32, i32, i32) {
    %c0_i32 = arith.constant 0 : i32
    %c0_i32_0 = arith.constant 0 : i32
    %c0_i32_1 = arith.constant 0 : i32
    %c0_i32_2 = arith.constant 0 : i32
    return %c0_i32, %c0_i32_0, %c0_i32_1 : i32, i32, i32
  }
  func.func @transform_5(%arg0: i32, %arg1: i32) -> (i32, i32, i32) {
    %c0_i32 = arith.constant 0 : i32
    %c0_i32_0 = arith.constant 0 : i32
    %c0_i32_1 = arith.constant 0 : i32
    %c0_i32_2 = arith.constant 0 : i32
    return %c0_i32, %c0_i32_0, %c0_i32_1 : i32, i32, i32
  }
  func.func @transform_6(%arg0: i32, %arg1: i32) -> (i32, i32) {
    %c0_i32 = arith.constant 0 : i32
    %c0_i32_0 = arith.constant 0 : i32
    %c0_i32_1 = arith.constant 0 : i32
    return %c0_i32, %c0_i32_0 : i32, i32
  }
  func.func @transform_7(%arg0: i32, %arg1: i32) -> (i32, i32, i32) {
    %c0_i32 = arith.constant 0 : i32
    %c0_i32_0 = arith.constant 0 : i32
    return %arg0, %arg1, %c0_i32 : i32, i32, i32
  }
}

module attributes {stable_mosaic.version = 11 : i64} {
  func.func @_dilated_block_kernel(%arg0: i32, %arg1: i32, %arg2: memref<1x16x64xbf16, #tpu.memory_space<vmem>>, %arg3: memref<1x16x64xbf16, #tpu.memory_space<vmem>>, %arg4: memref<64x384xbf16, #tpu.memory_space<vmem>>, %arg5: memref<6x64x128xbf16, #tpu.memory_space<vmem>>, %arg6: memref<3x128x128xbf16, #tpu.memory_space<vmem>>, %arg7: memref<3x1x128xf32, #tpu.memory_space<vmem>>, %arg8: memref<1x128xf32, #tpu.memory_space<vmem>>, %arg9: memref<1x16x128xf32, #tpu.memory_space<vmem>>) attributes {dimension_semantics = [#tpu.dimension_semantics<parallel>, #tpu.dimension_semantics<parallel>], iteration_bounds = array<i64: 2, 1>, scalar_prefetch = 0 : i64, scratch_operands = 0 : i64, tpu.core_type = #tpu.core_type<tc>, window_params = [{transform_indices = @transform_0, window_bounds = array<i64: 1, 16, 64>}, {transform_indices = @transform_1, window_bounds = array<i64: 1, 16, 64>}, {pipeline_mode = #tpu.pipeline_mode<synchronous>, transform_indices = @transform_2, window_bounds = array<i64: 64, 384>}, {pipeline_mode = #tpu.pipeline_mode<synchronous>, transform_indices = @transform_3, window_bounds = array<i64: 6, 64, 128>}, {pipeline_mode = #tpu.pipeline_mode<synchronous>, transform_indices = @transform_4, window_bounds = array<i64: 3, 128, 128>}, {pipeline_mode = #tpu.pipeline_mode<synchronous>, transform_indices = @transform_5, window_bounds = array<i64: 3, 1, 128>}, {pipeline_mode = #tpu.pipeline_mode<synchronous>, transform_indices = @transform_6, window_bounds = array<i64: 1, 128>}, {transform_indices = @transform_7, window_bounds = array<i64: 1, 16, 128>}]} {
    %c0 = arith.constant 0 : index
    %c0_0 = arith.constant 0 : index
    %c0_1 = arith.constant 0 : index
    %0 = vector.load %arg2[%c0, %c0_0, %c0_1] : memref<1x16x64xbf16, #tpu.memory_space<vmem>>, vector<1x16x64xbf16>
    %1 = vector.shape_cast %0 : vector<1x16x64xbf16> to vector<16x64xbf16>
    %c0_2 = arith.constant 0 : index
    %c0_3 = arith.constant 0 : index
    %c0_4 = arith.constant 0 : index
    %2 = vector.load %arg3[%c0_2, %c0_3, %c0_4] : memref<1x16x64xbf16, #tpu.memory_space<vmem>>, vector<1x16x64xbf16>
    %3 = vector.shape_cast %2 : vector<1x16x64xbf16> to vector<16x64xbf16>
    %4 = tpu.concatenate %1, %3 in 0 : vector<16x64xbf16>, vector<16x64xbf16> -> vector<32x64xbf16>
    %5 = vector.extract_strided_slice %4 {offsets = [6, 0], sizes = [16, 64], strides = [1, 1]} : vector<32x64xbf16> to vector<16x64xbf16>
    %c0_5 = arith.constant 0 : index
    %c0_6 = arith.constant 0 : index
    %6 = vector.load %arg4[%c0_5, %c0_6] : memref<64x384xbf16, #tpu.memory_space<vmem>>, vector<64x384xbf16>
    %cst = arith.constant dense<0.000000e+00> : vector<16x384xf32>
    %7 = tpu.matmul %5, %6, %cst {dimension_numbers = #tpu.dot_dimension_numbers<[1], [0], [0], [1], [0, 0, 1, 1], [], []>} : vector<16x64xbf16>, vector<64x384xbf16>, vector<16x384xf32> -> vector<16x384xf32>
    %8 = vector.extract_strided_slice %7 {offsets = [0, 0], sizes = [16, 128], strides = [1, 1]} : vector<16x384xf32> to vector<16x128xf32>
    %9 = vector.extract_strided_slice %7 {offsets = [0, 128], sizes = [16, 128], strides = [1, 1]} : vector<16x384xf32> to vector<16x128xf32>
    %10 = vector.extract_strided_slice %7 {offsets = [0, 256], sizes = [16, 128], strides = [1, 1]} : vector<16x384xf32> to vector<16x128xf32>
    %11 = vector.extract_strided_slice %4 {offsets = [0, 0], sizes = [16, 64], strides = [1, 1]} : vector<32x64xbf16> to vector<16x64xbf16>
    %c0_7 = arith.constant 0 : index
    %c0_8 = arith.constant 0 : index
    %c0_9 = arith.constant 0 : index
    %12 = vector.load %arg5[%c0_7, %c0_8, %c0_9] : memref<6x64x128xbf16, #tpu.memory_space<vmem>>, vector<1x64x128xbf16>
    %13 = vector.shape_cast %12 : vector<1x64x128xbf16> to vector<64x128xbf16>
    %cst_10 = arith.constant dense<0.000000e+00> : vector<16x128xf32>
    %14 = tpu.matmul %11, %13, %cst_10 {dimension_numbers = #tpu.dot_dimension_numbers<[1], [0], [0], [1], [0, 0, 1, 1], [], []>} : vector<16x64xbf16>, vector<64x128xbf16>, vector<16x128xf32> -> vector<16x128xf32>
    %15 = arith.addf %10, %14 : vector<16x128xf32>
    %16 = vector.extract_strided_slice %4 {offsets = [3, 0], sizes = [16, 64], strides = [1, 1]} : vector<32x64xbf16> to vector<16x64xbf16>
    %c1 = arith.constant 1 : index
    %c0_11 = arith.constant 0 : index
    %c0_12 = arith.constant 0 : index
    %17 = vector.load %arg5[%c1, %c0_11, %c0_12] : memref<6x64x128xbf16, #tpu.memory_space<vmem>>, vector<1x64x128xbf16>
    %18 = vector.shape_cast %17 : vector<1x64x128xbf16> to vector<64x128xbf16>
    %cst_13 = arith.constant dense<0.000000e+00> : vector<16x128xf32>
    %19 = tpu.matmul %16, %18, %cst_13 {dimension_numbers = #tpu.dot_dimension_numbers<[1], [0], [0], [1], [0, 0, 1, 1], [], []>} : vector<16x64xbf16>, vector<64x128xbf16>, vector<16x128xf32> -> vector<16x128xf32>
    %20 = arith.addf %9, %19 : vector<16x128xf32>
    %21 = vector.extract_strided_slice %4 {offsets = [5, 0], sizes = [16, 64], strides = [1, 1]} : vector<32x64xbf16> to vector<16x64xbf16>
    %c2 = arith.constant 2 : index
    %c0_14 = arith.constant 0 : index
    %c0_15 = arith.constant 0 : index
    %22 = vector.load %arg5[%c2, %c0_14, %c0_15] : memref<6x64x128xbf16, #tpu.memory_space<vmem>>, vector<1x64x128xbf16>
    %23 = vector.shape_cast %22 : vector<1x64x128xbf16> to vector<64x128xbf16>
    %cst_16 = arith.constant dense<0.000000e+00> : vector<16x128xf32>
    %24 = tpu.matmul %21, %23, %cst_16 {dimension_numbers = #tpu.dot_dimension_numbers<[1], [0], [0], [1], [0, 0, 1, 1], [], []>} : vector<16x64xbf16>, vector<64x128xbf16>, vector<16x128xf32> -> vector<16x128xf32>
    %25 = arith.addf %8, %24 : vector<16x128xf32>
    %26 = vector.extract_strided_slice %4 {offsets = [7, 0], sizes = [16, 64], strides = [1, 1]} : vector<32x64xbf16> to vector<16x64xbf16>
    %c3 = arith.constant 3 : index
    %c0_17 = arith.constant 0 : index
    %c0_18 = arith.constant 0 : index
    %27 = vector.load %arg5[%c3, %c0_17, %c0_18] : memref<6x64x128xbf16, #tpu.memory_space<vmem>>, vector<1x64x128xbf16>
    %28 = vector.shape_cast %27 : vector<1x64x128xbf16> to vector<64x128xbf16>
    %cst_19 = arith.constant dense<0.000000e+00> : vector<16x128xf32>
    %29 = tpu.matmul %26, %28, %cst_19 {dimension_numbers = #tpu.dot_dimension_numbers<[1], [0], [0], [1], [0, 0, 1, 1], [], []>} : vector<16x64xbf16>, vector<64x128xbf16>, vector<16x128xf32> -> vector<16x128xf32>
    %30 = arith.addf %25, %29 : vector<16x128xf32>
    %31 = vector.extract_strided_slice %4 {offsets = [9, 0], sizes = [16, 64], strides = [1, 1]} : vector<32x64xbf16> to vector<16x64xbf16>
    %c4 = arith.constant 4 : index
    %c0_20 = arith.constant 0 : index
    %c0_21 = arith.constant 0 : index
    %32 = vector.load %arg5[%c4, %c0_20, %c0_21] : memref<6x64x128xbf16, #tpu.memory_space<vmem>>, vector<1x64x128xbf16>
    %33 = vector.shape_cast %32 : vector<1x64x128xbf16> to vector<64x128xbf16>
    %cst_22 = arith.constant dense<0.000000e+00> : vector<16x128xf32>
    %34 = tpu.matmul %31, %33, %cst_22 {dimension_numbers = #tpu.dot_dimension_numbers<[1], [0], [0], [1], [0, 0, 1, 1], [], []>} : vector<16x64xbf16>, vector<64x128xbf16>, vector<16x128xf32> -> vector<16x128xf32>
    %35 = arith.addf %20, %34 : vector<16x128xf32>
    %36 = vector.extract_strided_slice %4 {offsets = [12, 0], sizes = [16, 64], strides = [1, 1]} : vector<32x64xbf16> to vector<16x64xbf16>
    %c5 = arith.constant 5 : index
    %c0_23 = arith.constant 0 : index
    %c0_24 = arith.constant 0 : index
    %37 = vector.load %arg5[%c5, %c0_23, %c0_24] : memref<6x64x128xbf16, #tpu.memory_space<vmem>>, vector<1x64x128xbf16>
    %38 = vector.shape_cast %37 : vector<1x64x128xbf16> to vector<64x128xbf16>
    %cst_25 = arith.constant dense<0.000000e+00> : vector<16x128xf32>
    %39 = tpu.matmul %36, %38, %cst_25 {dimension_numbers = #tpu.dot_dimension_numbers<[1], [0], [0], [1], [0, 0, 1, 1], [], []>} : vector<16x64xbf16>, vector<64x128xbf16>, vector<16x128xf32> -> vector<16x128xf32>
    %40 = arith.addf %15, %39 : vector<16x128xf32>
    %c0_26 = arith.constant 0 : index
    %c0_27 = arith.constant 0 : index
    %c0_28 = arith.constant 0 : index
    %41 = vector.load %arg7[%c0_26, %c0_27, %c0_28] : memref<3x1x128xf32, #tpu.memory_space<vmem>>, vector<1x1x128xf32>
    %42 = vector.shape_cast %41 : vector<1x1x128xf32> to vector<1x128xf32>
    %43 = vector.broadcast %42 : vector<1x128xf32> to vector<16x128xf32>
    %44 = arith.addf %30, %43 : vector<16x128xf32>
    %cst_29 = arith.constant 0.000000e+00 : f32
    %45 = vector.broadcast %cst_29 : f32 to vector<16x128xf32>
    %46 = arith.maximumf %44, %45 : vector<16x128xf32>
    %47 = arith.truncf %46 : vector<16x128xf32> to vector<16x128xbf16>
    %c0_30 = arith.constant 0 : index
    %c0_31 = arith.constant 0 : index
    %c0_32 = arith.constant 0 : index
    %48 = vector.load %arg6[%c0_30, %c0_31, %c0_32] : memref<3x128x128xbf16, #tpu.memory_space<vmem>>, vector<1x128x128xbf16>
    %49 = vector.shape_cast %48 : vector<1x128x128xbf16> to vector<128x128xbf16>
    %cst_33 = arith.constant dense<0.000000e+00> : vector<16x128xf32>
    %50 = tpu.matmul %47, %49, %cst_33 {dimension_numbers = #tpu.dot_dimension_numbers<[1], [0], [0], [1], [0, 0, 1, 1], [], []>} : vector<16x128xbf16>, vector<128x128xbf16>, vector<16x128xf32> -> vector<16x128xf32>
    %c1_34 = arith.constant 1 : index
    %c0_35 = arith.constant 0 : index
    %c0_36 = arith.constant 0 : index
    %51 = vector.load %arg7[%c1_34, %c0_35, %c0_36] : memref<3x1x128xf32, #tpu.memory_space<vmem>>, vector<1x1x128xf32>
    %52 = vector.shape_cast %51 : vector<1x1x128xf32> to vector<1x128xf32>
    %53 = vector.broadcast %52 : vector<1x128xf32> to vector<16x128xf32>
    %54 = arith.addf %35, %53 : vector<16x128xf32>
    %cst_37 = arith.constant 0.000000e+00 : f32
    %55 = vector.broadcast %cst_37 : f32 to vector<16x128xf32>
    %56 = arith.maximumf %54, %55 : vector<16x128xf32>
    %57 = arith.truncf %56 : vector<16x128xf32> to vector<16x128xbf16>
    %c1_38 = arith.constant 1 : index
    %c0_39 = arith.constant 0 : index
    %c0_40 = arith.constant 0 : index
    %58 = vector.load %arg6[%c1_38, %c0_39, %c0_40] : memref<3x128x128xbf16, #tpu.memory_space<vmem>>, vector<1x128x128xbf16>
    %59 = vector.shape_cast %58 : vector<1x128x128xbf16> to vector<128x128xbf16>
    %cst_41 = arith.constant dense<0.000000e+00> : vector<16x128xf32>
    %60 = tpu.matmul %57, %59, %cst_41 {dimension_numbers = #tpu.dot_dimension_numbers<[1], [0], [0], [1], [0, 0, 1, 1], [], []>} : vector<16x128xbf16>, vector<128x128xbf16>, vector<16x128xf32> -> vector<16x128xf32>
    %61 = arith.addf %50, %60 : vector<16x128xf32>
    %c2_42 = arith.constant 2 : index
    %c0_43 = arith.constant 0 : index
    %c0_44 = arith.constant 0 : index
    %62 = vector.load %arg7[%c2_42, %c0_43, %c0_44] : memref<3x1x128xf32, #tpu.memory_space<vmem>>, vector<1x1x128xf32>
    %63 = vector.shape_cast %62 : vector<1x1x128xf32> to vector<1x128xf32>
    %64 = vector.broadcast %63 : vector<1x128xf32> to vector<16x128xf32>
    %65 = arith.addf %40, %64 : vector<16x128xf32>
    %cst_45 = arith.constant 0.000000e+00 : f32
    %66 = vector.broadcast %cst_45 : f32 to vector<16x128xf32>
    %67 = arith.maximumf %65, %66 : vector<16x128xf32>
    %68 = arith.truncf %67 : vector<16x128xf32> to vector<16x128xbf16>
    %c2_46 = arith.constant 2 : index
    %c0_47 = arith.constant 0 : index
    %c0_48 = arith.constant 0 : index
    %69 = vector.load %arg6[%c2_46, %c0_47, %c0_48] : memref<3x128x128xbf16, #tpu.memory_space<vmem>>, vector<1x128x128xbf16>
    %70 = vector.shape_cast %69 : vector<1x128x128xbf16> to vector<128x128xbf16>
    %cst_49 = arith.constant dense<0.000000e+00> : vector<16x128xf32>
    %71 = tpu.matmul %68, %70, %cst_49 {dimension_numbers = #tpu.dot_dimension_numbers<[1], [0], [0], [1], [0, 0, 1, 1], [], []>} : vector<16x128xbf16>, vector<128x128xbf16>, vector<16x128xf32> -> vector<16x128xf32>
    %72 = arith.addf %61, %71 : vector<16x128xf32>
    %c0_50 = arith.constant 0 : index
    %c0_51 = arith.constant 0 : index
    %73 = vector.load %arg8[%c0_50, %c0_51] : memref<1x128xf32, #tpu.memory_space<vmem>>, vector<1x128xf32>
    %74 = vector.broadcast %73 : vector<1x128xf32> to vector<16x128xf32>
    %75 = arith.addf %72, %74 : vector<16x128xf32>
    %c0_52 = arith.constant 0 : index
    %c0_53 = arith.constant 0 : index
    %c0_54 = arith.constant 0 : index
    %76 = vector.load %arg9[%c0_52, %c0_53, %c0_54] : memref<1x16x128xf32, #tpu.memory_space<vmem>>, vector<1x16x128xf32>
    %77 = vector.shape_cast %76 : vector<1x16x128xf32> to vector<16x128xf32>
    %78 = vector.shape_cast %75 : vector<16x128xf32> to vector<1x16x128xf32>
    tpu.vector_store %arg9[%c0_52, %c0_53, %c0_54], %78 {strides = array<i32>} : memref<1x16x128xf32, #tpu.memory_space<vmem>>, vector<1x16x128xf32>,
    return
  }
  func.func @transform_0(%arg0: i32, %arg1: i32) -> (i32, i32, i32) {
    %c0_i32 = arith.constant 0 : i32
    %c0_i32_0 = arith.constant 0 : i32
    return %arg0, %arg1, %c0_i32 : i32, i32, i32
  }
  func.func @transform_1(%arg0: i32, %arg1: i32) -> (i32, i32, i32) {
    %c1_i32 = arith.constant 1 : i32
    %0 = arith.addi %arg1, %c1_i32 : i32
    %c1_i32_0 = arith.constant 1 : i32
    %1 = arith.muli %0, %c1_i32_0 : i32
    %c0_i32 = arith.constant 0 : i32
    %c0_i32_1 = arith.constant 0 : i32
    return %arg0, %1, %c0_i32 : i32, i32, i32
  }
  func.func @transform_2(%arg0: i32, %arg1: i32) -> (i32, i32) {
    %c0_i32 = arith.constant 0 : i32
    %c0_i32_0 = arith.constant 0 : i32
    %c0_i32_1 = arith.constant 0 : i32
    return %c0_i32, %c0_i32_0 : i32, i32
  }
  func.func @transform_3(%arg0: i32, %arg1: i32) -> (i32, i32, i32) {
    %c0_i32 = arith.constant 0 : i32
    %c0_i32_0 = arith.constant 0 : i32
    %c0_i32_1 = arith.constant 0 : i32
    %c0_i32_2 = arith.constant 0 : i32
    return %c0_i32, %c0_i32_0, %c0_i32_1 : i32, i32, i32
  }
  func.func @transform_4(%arg0: i32, %arg1: i32) -> (i32, i32, i32) {
    %c0_i32 = arith.constant 0 : i32
    %c0_i32_0 = arith.constant 0 : i32
    %c0_i32_1 = arith.constant 0 : i32
    %c0_i32_2 = arith.constant 0 : i32
    return %c0_i32, %c0_i32_0, %c0_i32_1 : i32, i32, i32
  }
  func.func @transform_5(%arg0: i32, %arg1: i32) -> (i32, i32, i32) {
    %c0_i32 = arith.constant 0 : i32
    %c0_i32_0 = arith.constant 0 : i32
    %c0_i32_1 = arith.constant 0 : i32
    %c0_i32_2 = arith.constant 0 : i32
    return %c0_i32, %c0_i32_0, %c0_i32_1 : i32, i32, i32
  }
  func.func @transform_6(%arg0: i32, %arg1: i32) -> (i32, i32) {
    %c0_i32 = arith.constant 0 : i32
    %c0_i32_0 = arith.constant 0 : i32
    %c0_i32_1 = arith.constant 0 : i32
    return %c0_i32, %c0_i32_0 : i32, i32
  }
  func.func @transform_7(%arg0: i32, %arg1: i32) -> (i32, i32, i32) {
    %c0_i32 = arith.constant 0 : i32
    %c0_i32_0 = arith.constant 0 : i32
    return %arg0, %arg1, %c0_i32 : i32, i32, i32
  }
}

</mosaic_0001>

<bundles_post_ra>
// kernel: tpu_custom_call.1
= control target key start
LH: loop header
LB: loop body
LE: loop exit
PB: predicated region body
PF: predicated region fallthrough
CT: control target
= control target key end

     0   :  { %s2337_s0 = inlined_call_operand.hbm [shape: bf16[2,32,64], index: 0, kind: input, shape index: {}]   ;;  %s2338_s1 = inlined_call_operand.hbm [shape: bf16[2,32,64], index: 1, kind: input, shape index: {}]   ;;  %s2339_s2 = inlined_call_operand.hbm [shape: bf16[64,384], index: 2, kind: input, shape index: {}]   ;;  %s2340_s3 = inlined_call_operand.hbm [shape: bf16[6,64,128], index: 3, kind: input, shape index: {}]   ;;  %s2341_s4 = inlined_call_operand.hbm [shape: bf16[3,128,128], index: 4, kind: input, shape index: {}]   ;;  %s2342_s5 = inlined_call_operand.vmem [shape: f32[3,1,128], index: 5, kind: input, shape index: {}]   ;;  %s2343_s6 = inlined_call_operand.vmem [shape: f32[1,128], index: 6, kind: input, shape index: {}]   ;;  %s2344_s7 = inlined_call_operand.hbm [shape: f32[2,16,128], index: 7, kind: output, shape index: {}]  }
   0x1   :  { %2352 = sst [smem:[#allocation21_spill]] %s2337_s0 }
   0x2   :  { %2353 = sst [smem:[#allocation22_spill]] %s2339_s2 }
   0x3   :  { %2354 = sst [smem:[#allocation23_spill]] %s2340_s3 }
   0x4   :  { %2355 = sst [smem:[#allocation24_spill]] %s2341_s4 }
   0x5   :  { %12 = vsyncpa [#allocation3], 0 }
   0x6   :  { %14 = vsyncpa [#allocation3 + $0x1], 0 }
   0x7   :  { %15 = vsyncpa [#allocation6], 0 }
   0x8   :  { %17 = vsyncpa [#allocation6 + $0x1], 0 }
   0x9   :  { %18 = vsyncpa [#allocation9], 0 }
   0xa   :  { %19 = vsyncpa [#allocation4], 0 }
   0xb   :  { %21 = vsyncpa [#allocation4 + $0x1], 0  ;;  %s2107_s24 = smov 0   ;;  %s2109_s25 = smov 0  }
   0xc   :  { %s2111_s26 = smov 0   ;;  %s2113_s27 = smov 0  }
   0xd   :  { %s2115_s28 = smov 0   ;;  %s2117_s29 = smov 0  }
   0xe LB: > { %2356 = sst [smem:[#allocation17_spill]] %s2044_s26  ;;  %s2138_s30 = sadd.s32 4294967295, %s2056_s29   ;;  %s2056_s29 = sphi %s2117_s29, %s27_s29   ;;  %s2052_s28 = sphi %s2115_s28, %s2375_s28   ;;  %s2048_s27 = sphi %s2113_s27, %s2374_s27   ;;  %s2044_s26 = sphi %s2111_s26, %s2373_s26   ;;  %s2040_s25 = sphi %s2109_s25, %s2377_s25   ;;  %s2036_s24 = sphi %s2107_s24, %s2376_s24  }
   0xf   : > { %2357 = sst [smem:[#allocation18_spill]] %s2052_s28  ;;  %s1356_s8 = sadd.s32 4294967294, %s2056_s29  }
  0x10   : > { %p61_p0 = scmp.ne.s32.totalorder %s2040_s25, %s2036_s24  ;;  %p62_p1 = scmp.eq.s32.totalorder %s2138_s30, 0 }
  0x11   : > { %p222_p2 = scmp.eq.s32.totalorder %s2138_s30, 1  ;;  %p228_p3 = scmp.eq.s32.totalorder %s1356_s8, 1 }
  0x12   : > { %p2147_p4 = por %p62_p1, %p61_p0  ;;  %p1357_p5 = scmp.ge.s32.totalorder %s2056_s29, 1 }
  0x13   : > { %p2152_p6 = por %p228_p3, %p61_p0  ;;  %p235_p7 = scmp.lt.s32.totalorder %s2056_s29, 3 }
  0x14   : > { %s2360_s2 = sld [smem:[#allocation22_spill]]  ;;  %s2058_s15 = smov [#allocation7]  }
  0x15   : > { %p2160_p8 = pnand %p1357_p5, %p235_p7  ;;  %s248_s16 = sshll.u32 %s2058_s15, 4  ;;  %s249_s16 = int_to_ptr.vmem [resolvable:$true] %s248_s16 }
  0x16   : > { %p1361_p11 = scmp.ge.s32.totalorder %s2056_s29, 2  ;;  %s2363_s3 = sld [smem:[#allocation23_spill]] }
  0x17   : > { %p1722_p9 = pneg %p2160_p8  ;;  %s2059_s21 = smov 192  }
  0x18   : > { %s2060_s22 = smov 12   ;;  %s2061_s23 = smov [#allocation8]  }
  0x19   : > { %p2168_p10 = pnand %p1722_p9, %p62_p1  ;;  %s262_s8 = sshll.u32 %s2061_s23, 4  ;;  %s263_s8 = int_to_ptr.vmem [resolvable:$true] %s262_s8 }
  0x1a   : > { %s246_s13 = sshll.u32 %s2360_s2, 4  ;;  %s2345_s11 = smov 64   ;;  %s247_s13 = int_to_ptr.hbm [resolvable:$true] %s246_s13 }
  0x1b   : > { %1725 = dma.hbm_to_vmem [thread:$0]  (!%p2168_p10), %s247_s13, 1536, %s249_s16, [#allocation6], %s2059_s21, %s2059_s21, %s2060_s22  }
  0x1c   : > { %s260_s20 = sshll.u32 %s2363_s3, 4  ;;  %s2347_s12 = smov 4   ;;  %s261_s20 = int_to_ptr.hbm [resolvable:$true] %s260_s20 }
  0x1d   : > { %1728 = dma.hbm_to_vmem [thread:$0]  (!%p2168_p10), %s261_s20, 3072, %s263_s8, [#allocation9], %s2345_s11, %s2345_s11, %s2347_s12  }
  0x1e   : > { %s2364_s4 = sld [smem:[#allocation24_spill]]  ;;  %s2064_s13 = smov [#allocation10]  }
  0x1f   : > { %s276_s16 = sshll.u32 %s2064_s13, 4  ;;  %s48_s21 = sadd.s32 1, %s2044_s26  ;;  %s277_s16 = int_to_ptr.vmem [resolvable:$true] %s276_s16 }
  0x20   : > { %s39_s22 = sadd.s32 1, %s2052_s28  ;;  %p55_p12 = scmp.ne.s32.totalorder %s2044_s26, %s2040_s25 }
  0x21   : > { %p41_p13 = scmp.ge.s32.totalorder %s39_s22, 2  ;;  %p56_p0 = scmp.eq.s32.totalorder %s2056_s29, 0 }
  0x22   : > { %p2198_p3 = por %p222_p2, %p55_p12  ;;  %p1746_p5 = scmp.lt.s32.totalorder %s2056_s29, 2 }
  0x23   : > { %s2379_s22 = smov (%p41_p13, %s39_s22), 0  ;;  %p2205_p7 = por %p56_p0, %p55_p12 }
  0x24   : > { %s274_s19 = sshll.u32 %s2364_s4, 4  ;;  %2366 = sst [smem:[#allocation19_spill]] %s2379_s22  ;;  %s275_s19 = int_to_ptr.hbm [resolvable:$true] %s274_s19 }
  0x25   : > { %1731 = dma.hbm_to_vmem [thread:$0]  (!%p2168_p10), %s275_s19, 3072, %s277_s16, [#allocation9], %s2345_s11, %s2345_s11, %s2347_s12  }
  0x26   : > { %s296_s23 = sand.u32 1, %s2044_s26   ;;  %s43_s8 = ssub.s32 %s2052_s28, %s2379_s22 }
  0x27   : > { %p46_p9 = scmp.eq.s32.totalorder %s43_s8, 0  ;;  %s1362_s15 = sshll.u32 %s296_s23, 3 }
  0x28   : > { %s1639_s18 = sshll.u32 %s2052_s28, 4  ;;  %s2369_s0 = sld [smem:[#allocation21_spill]] }
  0x29   : > { %s2214_s19 = scalar_select %p46_p9, %s2044_s26, %s48_s21  }
  0x2a   : > { %s300_s12 = scalar_lea.vmem [#allocation2], %s1362_s15  ;;  %p1733_p2 = pnand %p1746_p5, %p2205_p7 }
  0x2b   : > { %2368 = sst [smem:[#allocation20_spill]] %s2214_s19  ;;  %s310_s2 = sshll.u32 %s300_s12, 4  ;;  %s311_s2 = int_to_ptr.vmem [resolvable:$true] %s310_s2 }
  0x2c   : > { %s1259_s8 = scalar_lea.hbm %s2338_s1, %s1639_s18  ;;  %s297_s21 = scalar_lea.sflag [#allocation3], %s296_s23 }
  0x2d   : > { %s1260_s28 = scalar_lea.hbm %s1259_s8, 8  ;;  %s2370_s19 = smov 4  }
  0x2e   : > { %s307_s11 = scalar_lea.hbm %s2369_s0, %s1639_s18  ;;  %s2371_s26 = smov 64  }
  0x2f   : > { %s308_s3 = sshll.u32 %s307_s11, 4  ;;  %s333_s13 = sshll.u32 %s1260_s28, 4  ;;  %s309_s3 = int_to_ptr.hbm [resolvable:$true] %s308_s3  ;;  %s334_s13 = int_to_ptr.hbm [resolvable:$true] %s333_s13 }
  0x30   : > { %1735 = dma.hbm_to_vmem [thread:$0]  (!%p1733_p2), %s309_s3, 128, %s311_s2, %s297_s21, %s2371_s26, %s2371_s26, %s2370_s19  }
  0x31   : > { %s324_s16 = scalar_lea.vmem [#allocation5], %s1362_s15  ;;  %s320_s11 = sand.u32 1, %s2056_s29  }
  0x32   : > { %s335_s0 = sshll.u32 %s324_s16, 4  ;;  %s321_s12 = scalar_lea.sflag [#allocation6], %s320_s11  ;;  %s336_s0 = int_to_ptr.vmem [resolvable:$true] %s335_s0 }
  0x33   : > { %1738 = dma.hbm_to_vmem [thread:$0]  (!%p1733_p2), %s334_s13, 128, %s336_s0, %s321_s12, %s2371_s26, %s2371_s26, %s2370_s19  }
  0x34   : > { %347 = sbr.rel (%p2160_p8) target bundleno = 405 (0x195), region = 48  ;;  %s2236_s4 = sand.u32 (!%p2160_p8), 1, %s2040_s25  }
  0x35   : > { %s1369_s2 = sshll.u32 (!%p2160_p8), %s2236_s4, 3  ;;  %s350_s3 = scalar_lea.sflag (!%p2160_p8), [#allocation3], %s2236_s4 }
  0x36   : > { %s2240_s28 = scalar_lea.vmem (!%p2160_p8), [#allocation2], %s1369_s2 }
  0x39   : > { %2015 = dma.done.wait (%p2147_p4), %s350_s3, 128  }
  0x3a   : > { %2017 = vsyncadd (%p2147_p4), %s350_s3, 4294967168  ;;  %s359_s0 = sand.u32 1, %s2138_s30   ;;  %s2247_s14 = scalar_lea.vmem [#allocation5], %s1369_s2 }
  0x3b   : > { %s360_s26 = scalar_lea.sflag [#allocation6], %s359_s0 }
  0x3c   : > { %2019 = dma.done.wait (%p2147_p4), %s360_s26, 128  }
  0x3d   : > { %2021 = vsyncadd (%p2147_p4), %s360_s26, 4294967168 }
  0x3e   : > { %2023 = dma.done.wait (%p62_p1), [#allocation6], 1536  }
  0x3f   : > { %2025 = vsyncadd (%p62_p1), [#allocation6], 4294965760 }
  0x40   : > { %2027 = dma.done.wait (%p62_p1), [#allocation9], 6144  }
  0x41   : > { %2029 = vsyncadd (%p62_p1), [#allocation9], 4294961152  ;;  %v1421_v0 = vld [vmem:[#allocation7 + $0x48] sm:$0xf]  ;;  %v1653_v1 = vld [vmem:[#allocation7 + $0x50] sm:$0xf0] }
  0x42   : > { %v1652_v2 = vld [vmem:[#allocation7 + $0x4c] sm:$0xf]  ;;  %v1422_v3 = vor.u32 %v1653_v1, %v1421_v0  ;;  %v1423_v4 = vld [vmem:[#allocation7 + $0x54] sm:$0xf0]  ;;  %v1429_v5 = vld [vmem:[#allocation7 + $0x50] sm:$0xf] }
  0x43   : > { %v1654_v6 = vld [vmem:[#allocation7 + $0x58] sm:$0xf0]  ;;  %v1426_v7 = vor.u32 %v1652_v2, %v1423_v4  ;;  %v1409_v10 = vld [vmem:[#allocation7 + $0x30] sm:$0xf]  ;;  %v1649_v13 = vld [vmem:[#allocation7 + $0x34] sm:$0xf] }
  0x44   : > { %v1430_v8 = vor.u32 %v1654_v6, %v1429_v5  ;;  %v1658_v9 = vld [vmem:[#allocation8 + $0x18] sm:$0xff]  ;;  %526 = vmatpush.bf16.msra.mxu0 %v1422_v3  ;;  %v1411_v14 = vld [vmem:[#allocation7 + $0x3c] sm:$0xf0]  ;;  %v1651_v17 = vld [vmem:[#allocation7 + $0x40] sm:$0xf0]  ;;  %vm450_vm0 = vcmask 1044480  }
  0x45   : > { %v1650_v11 = vld [vmem:[#allocation7 + $0x38] sm:$0xf0]  ;;  %v1417_v15 = vld [vmem:[#allocation7 + $0x38] sm:$0xf]  ;;  %540 = vmatpush.bf16.msra.mxu1 %v1426_v7  ;;  %v1414_v16 = vor.u32 %v1649_v13, %v1411_v14  ;;  %v1657_v18 = vld [vmem:[#allocation8 + $0x10] sm:$0xff]  ;;  %603 = vmatpush.bf16.msra.mxu3 %v1658_v9  ;;  %vm518_vm1 = vcmask 523264  }
  0x46   : > { %v1410_v12 = vor.u32 %v1650_v11, %v1409_v10  ;;  %554 = vmatpush.bf16.msra.mxu2 %v1430_v8  ;;  %v1397_v19 = vld [vmem:[#allocation7 + $0x18] sm:$0xf]  ;;  %v1418_v20 = vor.u32 %v1651_v17, %v1417_v15  ;;  %v1647_v21 = vld [vmem:[#allocation7 + $0x20] sm:$0xf0]  ;;  %v1646_v22 = vld [vmem:[#allocation7 + $0x1c] sm:$0xf] }
  0x47   : > { %v1399_v23 = vld [vmem:[#allocation7 + $0x24] sm:$0xf0]  ;;  %v1405_v24 = vld [vmem:[#allocation7 + $0x20] sm:$0xf]  ;;  %v1648_v25 = vld [vmem:[#allocation7 + $0x28] sm:$0xf0]  ;;  %v1398_v26 = vor.u32 %v1647_v21, %v1397_v19 }
  0x48   : > { %527 = vmatpush.bf16.msra.mxu0 %v1410_v12  ;;  %v1656_v27 = vld [vmem:[#allocation8 + $0x8] sm:$0xff]  ;;  %v1385_v28 = vld [vmem:[#allocation7] sm:$0xf]  ;;  %v1402_v30 = vor.u32 %v1646_v22, %v1399_v23  ;;  %v1406_v31 = vor.u32 %v1648_v25, %v1405_v24  ;;  %v1643_v32 = vld [vmem:[#allocation7 + $0x4] sm:$0xf]  ;;  %vm873_vm6 = vcmask 1041408  }
  0x49   : > { %v1644_v29 = vld [vmem:[#allocation7 + $0x8] sm:$0xf0]  ;;  %541 = vmatpush.bf16.msra.mxu1 %v1414_v16  ;;  %v1387_v33 = vld [vmem:[#allocation7 + $0xc] sm:$0xf0]  ;;  %v1393_v34 = vld [vmem:[#allocation7 + $0x8] sm:$0xf]  ;;  %604 = vmatpush.bf16.msra.mxu3 %v1657_v18 }
  0x4a   : > { %555 = vmatpush.bf16.msra.mxu2 %v1418_v20  ;;  %v1645_v35 = vld [vmem:[#allocation7 + $0x10] sm:$0xf0]  ;;  %v2262_v36 = vld [vmem:[%s2240_s28] sm:$0xff]  ;;  %v1386_v38 = vor.u32 %v1644_v29, %v1385_v28  ;;  %v1390_v41 = vor.u32 %v1643_v32, %v1387_v33  ;;  %v1662_v44 = vld [vmem:[#allocation8 + $0x38] sm:$0xff]  ;;  %vm624_vm2 = vsmask.f32 6400 }
  0x4b   : > { %v2265_v37 = vld [vmem:[%s2247_s14] sm:$0xff]  ;;  %v451_v39 = vrot.slane %v2262_v36, 3  ;;  %v1394_v42 = vor.u32 %v1645_v35, %v1393_v34  ;;  %v1655_v43 = vld [vmem:[#allocation8] sm:$0xff]  ;;  %v625_v51 = vshrl.u32 %v2262_v36, 16  ;;  %v628_v52 = vshll.u32 %v2262_v36, 16  ;;  %v1660_v57 = vld [vmem:[#allocation8 + $0x28] sm:$0xff] }
  0x4c   : > { %528 = vmatpush.bf16.msra.mxu0 %v1398_v26  ;;  %v452_v40 = vrot.slane %v2265_v37, 3  ;;  %v1666_v45 = vld [vmem:[#allocation8 + $0x58] sm:$0xff]  ;;  %v1661_v49 = vld [vmem:[#allocation8 + $0x30] sm:$0xff]  ;;  %v633_v53 = vshrl.u32 %v2265_v37, 16  ;;  %v636_v54 = vshll.u32 %v2265_v37, 16  ;;  %v1664_v58 = vld [vmem:[#allocation8 + $0x48] sm:$0xff] }
  0x4d   : > { %542 = vmatpush.bf16.msra.mxu1 %v1402_v30  ;;  %605 = vmatpush.bf16.msra.mxu3 %v1656_v27  ;;  %v1670_v47 = vld [vmem:[#allocation8 + $0x78] sm:$0xff]  ;;  %v1665_v50 = vld [vmem:[#allocation8 + $0x50] sm:$0xff]  ;;  %v627_v59 = vrot.slane %v625_v51, 1  ;;  %v630_v60 = vrot.slane %v628_v52, 2  ;;  %v694_v61 = vrot.slane %v625_v51, 2  ;;  %v754_v62 = vrot.slane %v625_v51, 3 }
  0x4e   : > { %556 = vmatpush.bf16.msra.mxu2 %v1406_v31  ;;  %v453_v46 = vsel %vm450_vm0, %v451_v39, %v452_v40  ;;  %v1674_v48 = vld [vmem:[#allocation8 + $0x98] sm:$0xff]  ;;  %v1669_v55 = vld [vmem:[#allocation8 + $0x70] sm:$0xff]  ;;  %v635_v63 = vrot.slane %v633_v53, 1  ;;  %v638_v0 = vrot.slane %v636_v54, 2  ;;  %v695_v1 = vrot.slane %v628_v52, 3  ;;  %v1668_v3 = vld [vmem:[#allocation8 + $0x68] sm:$0xff] }
  0x4f   : > { %v1673_v56 = vld [vmem:[#allocation8 + $0x90] sm:$0xff]  ;;  %v697_v2 = vrot.slane %v633_v53, 2  ;;  %v698_v4 = vrot.slane %v636_v54, 3  ;;  %v755_v5 = vrot.slane %v628_v52, 4  ;;  %v757_v6 = vrot.slane %v633_v53, 3  ;;  %v1672_v8 = vld [vmem:[#allocation8 + $0x88] sm:$0xff] }
  0x50   : > { %529 = vmatpush.bf16.msra.mxu0 %v1386_v38  ;;  %v758_v7 = vrot.slane %v636_v54, 4  ;;  %v1659_v9 = vld [vmem:[#allocation8 + $0x20] sm:$0xff]  ;;  %v814_v10 = vrot.slane %v625_v51, 4  ;;  %v815_v11 = vrot.slane %v628_v52, 5  ;;  %v817_v12 = vrot.slane %v633_v53, 4  ;;  %v1678_v15 = vld [vmem:[#allocation8 + $0xb8] sm:$0xff] }
  0x51   : > { %543 = vmatpush.bf16.msra.mxu1 %v1390_v41  ;;  %606 = vmatpush.bf16.msra.mxu3 %v1655_v43  ;;  %v818_v13 = vrot.slane %v636_v54, 5  ;;  %v1663_v14 = vld [vmem:[#allocation8 + $0x40] sm:$0xff]  ;;  %v631_v16 = vor.u32 %v630_v60, %v627_v59  ;;  %v639_v17 = vor.u32 %v638_v0, %v635_v63  ;;  %v696_v19 = vor.u32 %v695_v1, %v694_v61  ;;  %v1677_v29 = vld [vmem:[#allocation8 + $0xb0] sm:$0xff]  ;;  %v1676_v31 = vld [vmem:[#allocation8 + $0xa8] sm:$0xff]  ;;  %s1374_s18 = sshll.u32 %s2236_s4, 4  ;;  %s1703_s21 = sshll.u32 %s2048_s27, 4 }
  0x52   : > { %557 = vmatpush.bf16.msra.mxu2 %v1394_v42  ;;  %v1667_v18 = vld [vmem:[#allocation8 + $0x60] sm:$0xff]  ;;  %v699_v20 = vor.u32 %v698_v4, %v697_v2  ;;  %v756_v21 = vor.u32 %v755_v5, %v754_v62  ;;  %v759_v22 = vor.u32 %v758_v7, %v757_v6  ;;  %vm693_vm3 = vsmask.f32 5376  ;;  %v1694_v38 = vld [vmem:[#allocation10 + $0x78] sm:$0xff]  ;;  %v1693_v40 = vld [vmem:[#allocation10 + $0x70] sm:$0xff]  ;;  %s414_s13 = scalar_lea.vmem [#allocation11], %s1374_s18  ;;  %s1209_s12 = scalar_lea.hbm %s2344_s7, %s1703_s21 }
  0x53   : > { %1431 = vmatmul.msk.bf16.vlgmr.msra.gmra.mxu0 %vm518_vm1, %v453_v46  ;;  %v1671_v23 = vld [vmem:[#allocation8 + $0x80] sm:$0xff]  ;;  %vm753_vm4 = vsmask.f32 4352  ;;  %v816_v24 = vor.u32 %v815_v11, %v814_v10  ;;  %v819_v25 = vor.u32 %v818_v13, %v817_v12  ;;  %vm813_vm5 = vsmask.f32 3328  ;;  %v1686_v39 = vld [vmem:[#allocation10 + $0x38] sm:$0xff] }
  0x54   : > { %672 = vmatpush.bf16.msrb.mxu0 %v1662_v44  ;;  %1432 = vmatmul.msk.bf16.vlgmr.msra.gmra.mxu1 %vm518_vm1, %v453_v46  ;;  %v640_v26 = vsel %vm624_vm2, %v631_v16, %v639_v17  ;;  %v700_v27 = vsel %vm693_vm3, %v696_v19, %v699_v20  ;;  %v760_v28 = vsel %vm753_vm4, %v756_v21, %v759_v22  ;;  %v1675_v32 = vld [vmem:[#allocation8 + $0xa0] sm:$0xff]  ;;  %v874_v33 = vrot.slane %v2262_v36, 6  ;;  %v1685_v41 = vld [vmem:[#allocation10 + $0x30] sm:$0xff]  ;;  %v1692_v42 = vld [vmem:[#allocation10 + $0x68] sm:$0xff]  ;;  %s1210_s2 = sshll.u32 %s414_s13, 4  ;;  %s1212_s3 = sshll.u32 %s1209_s12, 4  ;;  %s1211_s2 = int_to_ptr.vmem [resolvable:$true] %s1210_s2  ;;  %s1213_s3 = int_to_ptr.hbm [resolvable:$true] %s1212_s3 }
  0x55   : > { %732 = vmatpush.bf16.msrb.mxu1 %v1666_v45  ;;  %1433 = vmatmul.msk.bf16.vlgmr.msra.gmra.mxu2 %vm518_vm1, %v453_v46  ;;  %v820_v30 = vsel %vm813_vm5, %v816_v24, %v819_v25  ;;  %v875_v34 = vrot.slane %v2265_v37, 6  ;;  %v1684_v43 = vld [vmem:[#allocation10 + $0x28] sm:$0xff]  ;;  %v1702_v44 = vld [vmem:[#allocation10 + $0xb8] sm:$0xff]  ;;  %v1683_v37 = vld [vmem:[#allocation10 + $0x20] sm:$0xff]  ;;  %s1196_s27 = scalar_lea.sflag [#allocation4], %s2236_s4  ;;  %s1976_s28 = sshra.s32 %s1213_s3, 4  ;;  %s1977_s28 = int_to_ptr.hbm [resolvable:$true] %s1976_s28 }
  0x56   : > { %1450 = vmatmul.msk.bf16.vlgmr.msra.gmra.mxu3 %vm518_vm1, %v2262_v36  ;;  %792 = vmatpush.bf16.msrb.mxu2 %v1670_v47  ;;  %v1691_v36 = vld [vmem:[#allocation10 + $0x60] sm:$0xff]  ;;  %v1701_v45 = vld [vmem:[#allocation10 + $0xb0] sm:$0xff]  ;;  %v1690_v46 = vld [vmem:[#allocation10 + $0x58] sm:$0xff]  ;;  %s1978_s0 = scalar_lea.hbm %s1977_s28, 16  ;;  %s1982_s30 = scalar_lea.hbm %s2344_s7, 32 }
  0x57   : > { %852 = vmatpush.bf16.msrb.mxu3 %v1674_v48  ;;  %v876_v35 = vsel %vm873_vm6, %v874_v33, %v875_v34  ;;  %v1682_v47 = vld [vmem:[#allocation10 + $0x18] sm:$0xff]  ;;  %v1700_v48 = vld [vmem:[#allocation10 + $0xa8] sm:$0xff]  ;;  %v1699_v51 = vld [vmem:[#allocation10 + $0xa0] sm:$0xff]  ;;  %p1979_p1 = scmp.ne.s32.totalorder %s1977_s28, %s1978_s0  ;;  %p1983_p10 = scmp.lt.s32.totalorder %s1977_s28, %s2344_s7 }
  0x58   : > { %673 = vmatpush.bf16.msrb.mxu0 %v1661_v49  ;;  %v1689_v49 = vld [vmem:[#allocation10 + $0x50] sm:$0xff]  ;;  %v1688_v53 = vld [vmem:[#allocation10 + $0x48] sm:$0xff]  ;;  %v1695_v2 = vld [vmem:[#allocation10 + $0x80] sm:$0xff]  ;;  %p1984_p12 = scmp.lt.s32.totalorder %s1982_s30, %s1978_s0 }
  0x59   : > { %733 = vmatpush.bf16.msrb.mxu1 %v1665_v50  ;;  %v1681_v50 = vld [vmem:[#allocation10 + $0x10] sm:$0xff]  ;;  %v1696_v0 = vld [vmem:[#allocation10 + $0x88] sm:$0xff]  ;;  %v1808_v13 = vld [vmem:[%s2342_s5] ss:$0 sm:$0xff]  ;;  %p1980_p4 = pnand %p1979_p1, %p2198_p3 }
  0x5a   : > { %793 = vmatpush.bf16.msrb.mxu2 %v1669_v55  ;;  %v1680_v55 = vld [vmem:[#allocation10 + $0x8] sm:$0xff]  ;;  %v1697_v60 = vld [vmem:[#allocation10 + $0x90] sm:$0xff]  ;;  %v1810_v33 = vld [vmem:[%s2342_s5 + $0x2] ss:$0 sm:$0xff]  ;;  %p1985_p13 = por %p1984_p12, %p1983_p10 }
  0x5b   : > { %853 = vmatpush.bf16.msrb.mxu3 %v1673_v56  ;;  %v1698_v56 = vld [vmem:[#allocation10 + $0x98] sm:$0xff]  ;;  %p1981_p8 = pneg %p1980_p4 }
  0x5c   : > { %674 = vmatpush.bf16.msrb.mxu0 %v1660_v57  ;;  %v1687_v57 = vld [vmem:[#allocation10 + $0x40] sm:$0xff] }
  0x5d   : > { %734 = vmatpush.bf16.msrb.mxu1 %v1664_v58  ;;  %v1679_v58 = vld [vmem:[#allocation10] sm:$0xff]  ;;  %p1986_p0 = pnand %p1985_p13, %p1981_p8 }
  0x5e   : > { %794 = vmatpush.bf16.msrb.mxu2 %v1668_v3 }
  0x5f   : > { %854 = vmatpush.bf16.msrb.mxu3 %v1672_v8 }
  0x60   : > { %675 = vmatpush.bf16.msrb.mxu0 %v1659_v9 }
  0x61   : > { %735 = vmatpush.bf16.msrb.mxu1 %v1663_v14 }
  0x62   : > { %795 = vmatpush.bf16.msrb.mxu2 %v1667_v18 }
  0x63   : > { %855 = vmatpush.bf16.msrb.mxu3 %v1671_v23  ;;  %1467 = vmatmul.msk.bf16.vlgmr.msrb.gmra.mxu0 %vm518_vm1, %v640_v26 }
  0x64   : > { %908 = vmatpush.bf16.msra.mxu0 %v1678_v15  ;;  %1484 = vmatmul.msk.bf16.vlgmr.msrb.gmra.mxu1 %vm518_vm1, %v700_v27  ;;  %v1809_v15 = vld [vmem:[%s2342_s5 + $0x1] ss:$0 sm:$0xff] }
  0x65   : > { %1501 = vmatmul.msk.bf16.vlgmr.msrb.gmra.mxu2 %vm518_vm1, %v760_v28  ;;  %1020 = vmatpush.bf16.msra.mxu1 %v1694_v38 }
  0x66   : > { %1518 = vmatmul.msk.bf16.vlgmr.msrb.gmra.mxu3 %vm518_vm1, %v820_v30  ;;  %1082 = vmatpush.bf16.msra.mxu2 %v1686_v39 }
  0x67   : > { %1171 = vmatpush.bf16.msra.mxu3 %v1702_v44 }
  0x68   : > { %909 = vmatpush.bf16.msra.mxu0 %v1677_v29 }
  0x69   : > { %1021 = vmatpush.bf16.msra.mxu1 %v1693_v40 }
  0x6a   : > { %1083 = vmatpush.bf16.msra.mxu2 %v1685_v41 }
  0x6b   : > { %1172 = vmatpush.bf16.msra.mxu3 %v1701_v45 }
  0x6c   : > { %910 = vmatpush.bf16.msra.mxu0 %v1676_v31 }
  0x6d   : > { %1022 = vmatpush.bf16.msra.mxu1 %v1692_v42 }
  0x6e   : > { %1084 = vmatpush.bf16.msra.mxu2 %v1684_v43 }
  0x6f   : > { %1173 = vmatpush.bf16.msra.mxu3 %v1700_v48 }
  0x70   : > { %911 = vmatpush.bf16.msra.mxu0 %v1675_v32 }
  0x71   : > { %1023 = vmatpush.bf16.msra.mxu1 %v1691_v36 }
  0x72   : > { %1085 = vmatpush.bf16.msra.mxu2 %v1683_v37 }
  0x73   : > { %1535 = vmatmul.msk.bf16.vlgmr.msra.gmra.mxu0 %vm518_vm1, %v876_v35  ;;  %1174 = vmatpush.bf16.msra.mxu3 %v1699_v51 }
  0x75   : > { %1024 = vmatpush.bf16.msra.mxu1 %v1690_v46 }
  0x76   : > { %1086 = vmatpush.bf16.msra.mxu2 %v1682_v47  ;;  %v1811_v47 = vld [vmem:[%s2343_s6] ss:$0 sm:$0xff] }
  0x77   : > { %1175 = vmatpush.bf16.msra.mxu3 %v1698_v56 }
  0x79   : > { %1025 = vmatpush.bf16.msra.mxu1 %v1689_v49 }
  0x7a   : > { %1087 = vmatpush.bf16.msra.mxu2 %v1681_v50 }
  0x7b   : > { %1176 = vmatpush.bf16.msra.mxu3 %v1697_v60 }
  0x7d   : > { %1026 = vmatpush.bf16.msra.mxu1 %v1688_v53 }
  0x7e   : > { %1088 = vmatpush.bf16.msra.mxu2 %v1680_v55 }
  0x7f   : > { %1177 = vmatpush.bf16.msra.mxu3 %v1696_v0 }
  0x81   : > { %1027 = vmatpush.bf16.msra.mxu1 %v1687_v57 }
  0x82   : > { %1089 = vmatpush.bf16.msra.mxu2 %v1679_v58 }
  0x83   : > { %1178 = vmatpush.bf16.msra.mxu3 %v1695_v2 }
  0xd0   : > { %v531_v52 = vpop.f32.mrf.mxu0 }
  0xd1   : > { %v545_v54 = vpop.f32.mrf.mxu1 }
  0xd8   : > { %v559_v59 = vpop.f32.mrf.mxu2  ;;  %v533_v62 = vpop.f32.mrf.mxu0 }
  0xd9   : > { %v608_v61 = vpop.f32.mrf.mxu3  ;;  %v547_v63 = vpop.f32.mrf.mxu1 }
  0xda   : > { %v613_v26 = vadd.f32 %v608_v61, %v559_v59 }
  0xe0   : > { %v561_v1 = vpop.f32.mrf.mxu2  ;;  %v677_v4 = vpop.f32.mrf.mxu0 }
  0xe1   : > { %v610_v3 = vpop.f32.mrf.mxu3  ;;  %v737_v5 = vpop.f32.mrf.mxu1  ;;  %v682_v10 = vadd.f32 %v677_v4, %v545_v54 }
  0xe2   : > { %v742_v9 = vadd.f32 %v737_v5, %v531_v52  ;;  %v614_v35 = vadd.f32 %v610_v3, %v561_v1 }
  0xe8   : > { %v797_v6 = vpop.f32.mrf.mxu2  ;;  %v679_v8 = vpop.f32.mrf.mxu0 }
  0xe9   : > { %v857_v7 = vpop.f32.mrf.mxu3  ;;  %v739_v11 = vpop.f32.mrf.mxu1  ;;  %v802_v12 = vadd.f32 %v797_v6, %v742_v9  ;;  %v683_v17 = vadd.f32 %v679_v8, %v547_v63 }
  0xea   : > { %v862_v14 = vadd.f32 %v857_v7, %v682_v10  ;;  %v743_v16 = vadd.f32 %v739_v11, %v533_v62 }
  0xeb   : > { %v924_v19 = vadd.f32 %v1808_v13, %v802_v12 }
  0xec   : > { %v950_v23 = vadd.f32 %v1809_v15, %v862_v14 }
  0xed   : > { %v926_v28 = vmax.f32 %v924_v19, 0.0 }
  0xee   : > { %v952_v30 = vmax.f32 %v950_v23, 0.0 }
  0xf0   : > { %v799_v18 = vpop.f32.mrf.mxu2  ;;  %v913_v22 = vpop.f32.mrf.mxu0 }
  0xf1   : > { %v803_v20 = vadd.f32 %v799_v18, %v743_v16  ;;  %v859_v21 = vpop.f32.mrf.mxu3  ;;  %v918_v32 = vadd.f32 %v913_v22, %v613_v26 }
  0xf2   : > { %v863_v24 = vadd.f32 %v859_v21, %v683_v17 }
  0xf3   : > { %v925_v25 = vadd.f32 %v1808_v13, %v803_v20  ;;  %v1101_v40 = vadd.f32 %v1810_v33, %v918_v32 }
  0xf4   : > { %v951_v27 = vadd.f32 %v1809_v15, %v863_v24 }
  0xf5   : > { %v927_v29 = vmax.f32 %v925_v25, 0.0  ;;  %v1103_v43 = vmax.f32 %v1101_v40, 0.0 }
  0xf6   : > { %v953_v31 = vmax.f32 %v951_v27, 0.0 }
  0xf7   : > { %v928_v34 = vpack.c.bf16 %v927_v29, %v926_v28 }
  0xf8   : > { %v954_v38 = vpack.c.bf16 %v953_v31, %v952_v30  ;;  %v915_v39 = vpop.f32.mrf.mxu0 }
  0xf9   : > { %1090 = vmatmul.bf16.vlgmr.msra.gmra.mxu2 %v928_v34  ;;  %v919_v41 = vadd.f32 %v915_v39, %v614_v35 }
  0xfa   : > { %1028 = vmatmul.bf16.vlgmr.msra.gmra.mxu1 %v954_v38 }
  0xfb   : > { %v1102_v42 = vadd.f32 %v1810_v33, %v919_v41 }
  0xfd   : > { %v1104_v44 = vmax.f32 %v1102_v42, 0.0 }
  0xff   : > { %v1105_v36 = vpack.c.bf16 %v1104_v44, %v1103_v43 }
 0x101   : > { %1179 = vmatmul.bf16.vlgmr.msra.gmra.mxu3 %v1105_v36 }
 0x177   : > { %v1029_v45 = vpop.f32.mrf.mxu1 }
 0x17c   : > { %v1091_v37 = vpop.f32.mrf.mxu2 }
 0x17d   : > { %v1092_v46 = vadd.f32 %v1091_v37, %v1029_v45 }
 0x17f   : > { %v1031_v52 = vpop.f32.mrf.mxu1 }
 0x184   : > { %v1180_v48 = vpop.f32.mrf.mxu3  ;;  %v1093_v51 = vpop.f32.mrf.mxu2 }
 0x185   : > { %v1185_v49 = vadd.f32 %v1180_v48, %v1092_v46  ;;  %v1094_v53 = vadd.f32 %v1093_v51, %v1031_v52 }
 0x187   : > { %v1191_v50 = vadd.f32 %v1811_v47, %v1185_v49 }
 0x189   : > { %1193 = vst [vmem:[%s414_s13] sm:$0xff] %v1191_v50 }
 0x18c   : > { %v1182_v54 = vpop.f32.mrf.mxu3 }
 0x18d   : > { %v1186_v55 = vadd.f32 %v1182_v54, %v1094_v53 }
 0x18f   : > { %v1192_v56 = vadd.f32 %v1811_v47, %v1186_v55 }
 0x191   : > { %1194 = vst [vmem:[%s414_s13 + $0x8] sm:$0xff] %v1192_v56 }
 0x192   : > { %1989 = shalt.err (!%p1986_p0)
}
 0x193   : > { %s2065_s4 = smov 128   ;;  %s2066_s17 = smov 8  }
 0x194   : > { %1720 = dma.vmem_to_hbm [thread:$0]  (%p2198_p3), %s1211_s2, 256, %s1213_s3, %s1196_s27, %s2065_s4, %s2065_s4, %s2066_s17  }
 0x195 PF: > { %s1227_s23 = sand.u32 1, %s2036_s24   ;;  %p1740_p5 = pnand %p1361_p11, %p2152_p6 }
 0x196   : > { %s1228_s15 = scalar_lea.sflag [#allocation4], %s1227_s23 }
 0x197   : > { %p1741_p7 = pneg %p1740_p5 }
 0x199   : > { %2031 = dma.done.wait (%p1741_p7), %s1228_s15, 256  }
 0x19a   : > { %2033 = vsyncadd (%p1741_p7), %s1228_s15, 4294967040  ;;  %s27_s29 = sadd.s32 1, %s2056_s29   ;;  %s2372_s18 = sld [smem:[#allocation17_spill]] }
 0x19b   : > { %p24_p9 = scmp.ge.s32.totalorder %s27_s29, 4   ;;  %s2373_s26 = sld [smem:[#allocation20_spill]] }
 0x19c   : > { %s2374_s27 = sld [smem:[#allocation18_spill]]  ;;  %s2376_s24 = smov %s2040_s25 }
 0x19d   : > { %s2375_s28 = sld [smem:[#allocation19_spill]]  ;;  %26 = sbr.rel (!%p24_p9) target bundleno = 14 (0xe), region = 127 }
 0x1a0   : > { %s2377_s25 = smov %s2372_s18 }
 0x1a2   :  { %1234 = vsyncpa [#allocation3], 1 }
 0x1a3   :  { %1236 = vsyncpa [#allocation3 + $0x1], 1 }
 0x1a4   :  { %1237 = vsyncpa [#allocation6], 1 }
 0x1a5   :  { %1239 = vsyncpa [#allocation6 + $0x1], 1 }
 0x1a6   :  { %1240 = vsyncpa [#allocation9], 1 }
 0x1a7   :  { %1241 = vsyncpa [#allocation4], 1 }
 0x1a8   :  { %1243 = vsyncpa [#allocation4 + $0x1], 1 }

// kernel: tpu_custom_call.1
= control target key start
LH: loop header
LB: loop body
LE: loop exit
PB: predicated region body
PF: predicated region fallthrough
CT: control target
= control target key end

     0   :  { %s2337_s0 = inlined_call_operand.hbm [shape: bf16[2,32,64], index: 0, kind: input, shape index: {}]   ;;  %s2338_s1 = inlined_call_operand.hbm [shape: bf16[2,32,64], index: 1, kind: input, shape index: {}]   ;;  %s2339_s2 = inlined_call_operand.hbm [shape: bf16[64,384], index: 2, kind: input, shape index: {}]   ;;  %s2340_s3 = inlined_call_operand.hbm [shape: bf16[6,64,128], index: 3, kind: input, shape index: {}]   ;;  %s2341_s4 = inlined_call_operand.hbm [shape: bf16[3,128,128], index: 4, kind: input, shape index: {}]   ;;  %s2342_s5 = inlined_call_operand.vmem [shape: f32[3,1,128], index: 5, kind: input, shape index: {}]   ;;  %s2343_s6 = inlined_call_operand.vmem [shape: f32[1,128], index: 6, kind: input, shape index: {}]   ;;  %s2344_s7 = inlined_call_operand.hbm [shape: f32[2,16,128], index: 7, kind: output, shape index: {}]  }
   0x1   :  { %2352 = sst [smem:[#allocation21_spill]] %s2337_s0 }
   0x2   :  { %2353 = sst [smem:[#allocation22_spill]] %s2339_s2 }
   0x3   :  { %2354 = sst [smem:[#allocation23_spill]] %s2340_s3 }
   0x4   :  { %2355 = sst [smem:[#allocation24_spill]] %s2341_s4 }
   0x5   :  { %12 = vsyncpa [#allocation3], 0 }
   0x6   :  { %14 = vsyncpa [#allocation3 + $0x1], 0 }
   0x7   :  { %15 = vsyncpa [#allocation6], 0 }
   0x8   :  { %17 = vsyncpa [#allocation6 + $0x1], 0 }
   0x9   :  { %18 = vsyncpa [#allocation9], 0 }
   0xa   :  { %19 = vsyncpa [#allocation4], 0 }
   0xb   :  { %21 = vsyncpa [#allocation4 + $0x1], 0  ;;  %s2107_s24 = smov 0   ;;  %s2109_s25 = smov 0  }
   0xc   :  { %s2111_s26 = smov 0   ;;  %s2113_s27 = smov 0  }
   0xd   :  { %s2115_s28 = smov 0   ;;  %s2117_s29 = smov 0  }
   0xe LB: > { %2356 = sst [smem:[#allocation17_spill]] %s2044_s26  ;;  %s2138_s30 = sadd.s32 4294967295, %s2056_s29   ;;  %s2056_s29 = sphi %s2117_s29, %s27_s29   ;;  %s2052_s28 = sphi %s2115_s28, %s2375_s28   ;;  %s2048_s27 = sphi %s2113_s27, %s2374_s27   ;;  %s2044_s26 = sphi %s2111_s26, %s2373_s26   ;;  %s2040_s25 = sphi %s2109_s25, %s2377_s25   ;;  %s2036_s24 = sphi %s2107_s24, %s2376_s24  }
   0xf   : > { %2357 = sst [smem:[#allocation18_spill]] %s2052_s28  ;;  %s1356_s8 = sadd.s32 4294967294, %s2056_s29  }
  0x10   : > { %p61_p0 = scmp.ne.s32.totalorder %s2040_s25, %s2036_s24  ;;  %p62_p1 = scmp.eq.s32.totalorder %s2138_s30, 0 }
  0x11   : > { %p222_p2 = scmp.eq.s32.totalorder %s2138_s30, 1  ;;  %p228_p3 = scmp.eq.s32.totalorder %s1356_s8, 1 }
  0x12   : > { %p2147_p4 = por %p62_p1, %p61_p0  ;;  %p1357_p5 = scmp.ge.s32.totalorder %s2056_s29, 1 }
  0x13   : > { %p2152_p6 = por %p228_p3, %p61_p0  ;;  %p235_p7 = scmp.lt.s32.totalorder %s2056_s29, 3 }
  0x14   : > { %s2360_s2 = sld [smem:[#allocation22_spill]]  ;;  %s2058_s15 = smov [#allocation7]  }
  0x15   : > { %p2160_p8 = pnand %p1357_p5, %p235_p7  ;;  %s248_s16 = sshll.u32 %s2058_s15, 4  ;;  %s249_s16 = int_to_ptr.vmem [resolvable:$true] %s248_s16 }
  0x16   : > { %p1361_p11 = scmp.ge.s32.totalorder %s2056_s29, 2  ;;  %s2363_s3 = sld [smem:[#allocation23_spill]] }
  0x17   : > { %p1722_p9 = pneg %p2160_p8  ;;  %s2059_s21 = smov 192  }
  0x18   : > { %s2060_s22 = smov 12   ;;  %s2061_s23 = smov [#allocation8]  }
  0x19   : > { %p2168_p10 = pnand %p1722_p9, %p62_p1  ;;  %s262_s8 = sshll.u32 %s2061_s23, 4  ;;  %s263_s8 = int_to_ptr.vmem [resolvable:$true] %s262_s8 }
  0x1a   : > { %s246_s13 = sshll.u32 %s2360_s2, 4  ;;  %s2345_s11 = smov 64   ;;  %s247_s13 = int_to_ptr.hbm [resolvable:$true] %s246_s13 }
  0x1b   : > { %1725 = dma.hbm_to_vmem [thread:$0]  (!%p2168_p10), %s247_s13, 1536, %s249_s16, [#allocation6], %s2059_s21, %s2059_s21, %s2060_s22  }
  0x1c   : > { %s260_s20 = sshll.u32 %s2363_s3, 4  ;;  %s2347_s12 = smov 4   ;;  %s261_s20 = int_to_ptr.hbm [resolvable:$true] %s260_s20 }
  0x1d   : > { %1728 = dma.hbm_to_vmem [thread:$0]  (!%p2168_p10), %s261_s20, 3072, %s263_s8, [#allocation9], %s2345_s11, %s2345_s11, %s2347_s12  }
  0x1e   : > { %s2364_s4 = sld [smem:[#allocation24_spill]]  ;;  %s2064_s13 = smov [#allocation10]  }
  0x1f   : > { %s276_s16 = sshll.u32 %s2064_s13, 4  ;;  %s48_s21 = sadd.s32 1, %s2044_s26  ;;  %s277_s16 = int_to_ptr.vmem [resolvable:$true] %s276_s16 }
  0x20   : > { %s39_s22 = sadd.s32 1, %s2052_s28  ;;  %p55_p12 = scmp.ne.s32.totalorder %s2044_s26, %s2040_s25 }
  0x21   : > { %p41_p13 = scmp.ge.s32.totalorder %s39_s22, 2  ;;  %p56_p0 = scmp.eq.s32.totalorder %s2056_s29, 0 }
  0x22   : > { %p2198_p3 = por %p222_p2, %p55_p12  ;;  %p1746_p5 = scmp.lt.s32.totalorder %s2056_s29, 2 }
  0x23   : > { %s2379_s22 = smov (%p41_p13, %s39_s22), 0  ;;  %p2205_p7 = por %p56_p0, %p55_p12 }
  0x24   : > { %s274_s19 = sshll.u32 %s2364_s4, 4  ;;  %2366 = sst [smem:[#allocation19_spill]] %s2379_s22  ;;  %s275_s19 = int_to_ptr.hbm [resolvable:$true] %s274_s19 }
  0x25   : > { %1731 = dma.hbm_to_vmem [thread:$0]  (!%p2168_p10), %s275_s19, 3072, %s277_s16, [#allocation9], %s2345_s11, %s2345_s11, %s2347_s12  }
  0x26   : > { %s296_s23 = sand.u32 1, %s2044_s26   ;;  %s43_s8 = ssub.s32 %s2052_s28, %s2379_s22 }
  0x27   : > { %p46_p9 = scmp.eq.s32.totalorder %s43_s8, 0  ;;  %s1362_s15 = sshll.u32 %s296_s23, 3 }
  0x28   : > { %s1639_s18 = sshll.u32 %s2052_s28, 4  ;;  %s2369_s0 = sld [smem:[#allocation21_spill]] }
  0x29   : > { %s2214_s19 = scalar_select %p46_p9, %s2044_s26, %s48_s21  }
  0x2a   : > { %s300_s12 = scalar_lea.vmem [#allocation2], %s1362_s15  ;;  %p1733_p2 = pnand %p1746_p5, %p2205_p7 }
  0x2b   : > { %2368 = sst [smem:[#allocation20_spill]] %s2214_s19  ;;  %s310_s2 = sshll.u32 %s300_s12, 4  ;;  %s311_s2 = int_to_ptr.vmem [resolvable:$true] %s310_s2 }
  0x2c   : > { %s1259_s8 = scalar_lea.hbm %s2338_s1, %s1639_s18  ;;  %s297_s21 = scalar_lea.sflag [#allocation3], %s296_s23 }
  0x2d   : > { %s1260_s28 = scalar_lea.hbm %s1259_s8, 8  ;;  %s2370_s19 = smov 4  }
  0x2e   : > { %s307_s11 = scalar_lea.hbm %s2369_s0, %s1639_s18  ;;  %s2371_s26 = smov 64  }
  0x2f   : > { %s308_s3 = sshll.u32 %s307_s11, 4  ;;  %s333_s13 = sshll.u32 %s1260_s28, 4  ;;  %s309_s3 = int_to_ptr.hbm [resolvable:$true] %s308_s3  ;;  %s334_s13 = int_to_ptr.hbm [resolvable:$true] %s333_s13 }
  0x30   : > { %1735 = dma.hbm_to_vmem [thread:$0]  (!%p1733_p2), %s309_s3, 128, %s311_s2, %s297_s21, %s2371_s26, %s2371_s26, %s2370_s19  }
  0x31   : > { %s324_s16 = scalar_lea.vmem [#allocation5], %s1362_s15  ;;  %s320_s11 = sand.u32 1, %s2056_s29  }
  0x32   : > { %s335_s0 = sshll.u32 %s324_s16, 4  ;;  %s321_s12 = scalar_lea.sflag [#allocation6], %s320_s11  ;;  %s336_s0 = int_to_ptr.vmem [resolvable:$true] %s335_s0 }
  0x33   : > { %1738 = dma.hbm_to_vmem [thread:$0]  (!%p1733_p2), %s334_s13, 128, %s336_s0, %s321_s12, %s2371_s26, %s2371_s26, %s2370_s19  }
  0x34   : > { %347 = sbr.rel (%p2160_p8) target bundleno = 405 (0x195), region = 48  ;;  %s2236_s4 = sand.u32 (!%p2160_p8), 1, %s2040_s25  }
  0x35   : > { %s1369_s2 = sshll.u32 (!%p2160_p8), %s2236_s4, 3  ;;  %s350_s3 = scalar_lea.sflag (!%p2160_p8), [#allocation3], %s2236_s4 }
  0x36   : > { %s2240_s28 = scalar_lea.vmem (!%p2160_p8), [#allocation2], %s1369_s2 }
  0x39   : > { %2015 = dma.done.wait (%p2147_p4), %s350_s3, 128  }
  0x3a   : > { %2017 = vsyncadd (%p2147_p4), %s350_s3, 4294967168  ;;  %s359_s0 = sand.u32 1, %s2138_s30   ;;  %s2247_s14 = scalar_lea.vmem [#allocation5], %s1369_s2 }
  0x3b   : > { %s360_s26 = scalar_lea.sflag [#allocation6], %s359_s0 }
  0x3c   : > { %2019 = dma.done.wait (%p2147_p4), %s360_s26, 128  }
  0x3d   : > { %2021 = vsyncadd (%p2147_p4), %s360_s26, 4294967168 }
  0x3e   : > { %2023 = dma.done.wait (%p62_p1), [#allocation6], 1536  }
  0x3f   : > { %2025 = vsyncadd (%p62_p1), [#allocation6], 4294965760 }
  0x40   : > { %2027 = dma.done.wait (%p62_p1), [#allocation9], 6144  }
  0x41   : > { %2029 = vsyncadd (%p62_p1), [#allocation9], 4294961152  ;;  %v1421_v0 = vld [vmem:[#allocation7 + $0x48] sm:$0xf]  ;;  %v1653_v1 = vld [vmem:[#allocation7 + $0x50] sm:$0xf0] }
  0x42   : > { %v1652_v2 = vld [vmem:[#allocation7 + $0x4c] sm:$0xf]  ;;  %v1422_v3 = vor.u32 %v1653_v1, %v1421_v0  ;;  %v1423_v4 = vld [vmem:[#allocation7 + $0x54] sm:$0xf0]  ;;  %v1429_v5 = vld [vmem:[#allocation7 + $0x50] sm:$0xf] }
  0x43   : > { %v1654_v6 = vld [vmem:[#allocation7 + $0x58] sm:$0xf0]  ;;  %v1426_v7 = vor.u32 %v1652_v2, %v1423_v4  ;;  %v1409_v10 = vld [vmem:[#allocation7 + $0x30] sm:$0xf]  ;;  %v1649_v13 = vld [vmem:[#allocation7 + $0x34] sm:$0xf] }
  0x44   : > { %v1430_v8 = vor.u32 %v1654_v6, %v1429_v5  ;;  %v1658_v9 = vld [vmem:[#allocation8 + $0x18] sm:$0xff]  ;;  %526 = vmatpush.bf16.msra.mxu0 %v1422_v3  ;;  %v1411_v14 = vld [vmem:[#allocation7 + $0x3c] sm:$0xf0]  ;;  %v1651_v17 = vld [vmem:[#allocation7 + $0x40] sm:$0xf0]  ;;  %vm450_vm0 = vcmask 1044480  }
  0x45   : > { %v1650_v11 = vld [vmem:[#allocation7 + $0x38] sm:$0xf0]  ;;  %v1417_v15 = vld [vmem:[#allocation7 + $0x38] sm:$0xf]  ;;  %540 = vmatpush.bf16.msra.mxu1 %v1426_v7  ;;  %v1414_v16 = vor.u32 %v1649_v13, %v1411_v14  ;;  %v1657_v18 = vld [vmem:[#allocation8 + $0x10] sm:$0xff]  ;;  %603 = vmatpush.bf16.msra.mxu3 %v1658_v9  ;;  %vm518_vm1 = vcmask 523264  }
  0x46   : > { %v1410_v12 = vor.u32 %v1650_v11, %v1409_v10  ;;  %554 = vmatpush.bf16.msra.mxu2 %v1430_v8  ;;  %v1397_v19 = vld [vmem:[#allocation7 + $0x18] sm:$0xf]  ;;  %v1418_v20 = vor.u32 %v1651_v17, %v1417_v15  ;;  %v1647_v21 = vld [vmem:[#allocation7 + $0x20] sm:$0xf0]  ;;  %v1646_v22 = vld [vmem:[#allocation7 + $0x1c] sm:$0xf] }
  0x47   : > { %v1399_v23 = vld [vmem:[#allocation7 + $0x24] sm:$0xf0]  ;;  %v1405_v24 = vld [vmem:[#allocation7 + $0x20] sm:$0xf]  ;;  %v1648_v25 = vld [vmem:[#allocation7 + $0x28] sm:$0xf0]  ;;  %v1398_v26 = vor.u32 %v1647_v21, %v1397_v19 }
  0x48   : > { %527 = vmatpush.bf16.msra.mxu0 %v1410_v12  ;;  %v1656_v27 = vld [vmem:[#allocation8 + $0x8] sm:$0xff]  ;;  %v1385_v28 = vld [vmem:[#allocation7] sm:$0xf]  ;;  %v1402_v30 = vor.u32 %v1646_v22, %v1399_v23  ;;  %v1406_v31 = vor.u32 %v1648_v25, %v1405_v24  ;;  %v1643_v32 = vld [vmem:[#allocation7 + $0x4] sm:$0xf]  ;;  %vm873_vm6 = vcmask 1041408  }
  0x49   : > { %v1644_v29 = vld [vmem:[#allocation7 + $0x8] sm:$0xf0]  ;;  %541 = vmatpush.bf16.msra.mxu1 %v1414_v16  ;;  %v1387_v33 = vld [vmem:[#allocation7 + $0xc] sm:$0xf0]  ;;  %v1393_v34 = vld [vmem:[#allocation7 + $0x8] sm:$0xf]  ;;  %604 = vmatpush.bf16.msra.mxu3 %v1657_v18 }
  0x4a   : > { %555 = vmatpush.bf16.msra.mxu2 %v1418_v20  ;;  %v1645_v35 = vld [vmem:[#allocation7 + $0x10] sm:$0xf0]  ;;  %v2262_v36 = vld [vmem:[%s2240_s28] sm:$0xff]  ;;  %v1386_v38 = vor.u32 %v1644_v29, %v1385_v28  ;;  %v1390_v41 = vor.u32 %v1643_v32, %v1387_v33  ;;  %v1662_v44 = vld [vmem:[#allocation8 + $0x38] sm:$0xff]  ;;  %vm624_vm2 = vsmask.f32 6400 }
  0x4b   : > { %v2265_v37 = vld [vmem:[%s2247_s14] sm:$0xff]  ;;  %v451_v39 = vrot.slane %v2262_v36, 3  ;;  %v1394_v42 = vor.u32 %v1645_v35, %v1393_v34  ;;  %v1655_v43 = vld [vmem:[#allocation8] sm:$0xff]  ;;  %v625_v51 = vshrl.u32 %v2262_v36, 16  ;;  %v628_v52 = vshll.u32 %v2262_v36, 16  ;;  %v1660_v57 = vld [vmem:[#allocation8 + $0x28] sm:$0xff] }
  0x4c   : > { %528 = vmatpush.bf16.msra.mxu0 %v1398_v26  ;;  %v452_v40 = vrot.slane %v2265_v37, 3  ;;  %v1666_v45 = vld [vmem:[#allocation8 + $0x58] sm:$0xff]  ;;  %v1661_v49 = vld [vmem:[#allocation8 + $0x30] sm:$0xff]  ;;  %v633_v53 = vshrl.u32 %v2265_v37, 16  ;;  %v636_v54 = vshll.u32 %v2265_v37, 16  ;;  %v1664_v58 = vld [vmem:[#allocation8 + $0x48] sm:$0xff] }
  0x4d   : > { %542 = vmatpush.bf16.msra.mxu1 %v1402_v30  ;;  %605 = vmatpush.bf16.msra.mxu3 %v1656_v27  ;;  %v1670_v47 = vld [vmem:[#allocation8 + $0x78] sm:$0xff]  ;;  %v1665_v50 = vld [vmem:[#allocation8 + $0x50] sm:$0xff]  ;;  %v627_v59 = vrot.slane %v625_v51, 1  ;;  %v630_v60 = vrot.slane %v628_v52, 2  ;;  %v694_v61 = vrot.slane %v625_v51, 2  ;;  %v754_v62 = vrot.slane %v625_v51, 3 }
  0x4e   : > { %556 = vmatpush.bf16.msra.mxu2 %v1406_v31  ;;  %v453_v46 = vsel %vm450_vm0, %v451_v39, %v452_v40  ;;  %v1674_v48 = vld [vmem:[#allocation8 + $0x98] sm:$0xff]  ;;  %v1669_v55 = vld [vmem:[#allocation8 + $0x70] sm:$0xff]  ;;  %v635_v63 = vrot.slane %v633_v53, 1  ;;  %v638_v0 = vrot.slane %v636_v54, 2  ;;  %v695_v1 = vrot.slane %v628_v52, 3  ;;  %v1668_v3 = vld [vmem:[#allocation8 + $0x68] sm:$0xff] }
  0x4f   : > { %v1673_v56 = vld [vmem:[#allocation8 + $0x90] sm:$0xff]  ;;  %v697_v2 = vrot.slane %v633_v53, 2  ;;  %v698_v4 = vrot.slane %v636_v54, 3  ;;  %v755_v5 = vrot.slane %v628_v52, 4  ;;  %v757_v6 = vrot.slane %v633_v53, 3  ;;  %v1672_v8 = vld [vmem:[#allocation8 + $0x88] sm:$0xff] }
  0x50   : > { %529 = vmatpush.bf16.msra.mxu0 %v1386_v38  ;;  %v758_v7 = vrot.slane %v636_v54, 4  ;;  %v1659_v9 = vld [vmem:[#allocation8 + $0x20] sm:$0xff]  ;;  %v814_v10 = vrot.slane %v625_v51, 4  ;;  %v815_v11 = vrot.slane %v628_v52, 5  ;;  %v817_v12 = vrot.slane %v633_v53, 4  ;;  %v1678_v15 = vld [vmem:[#allocation8 + $0xb8] sm:$0xff] }
  0x51   : > { %543 = vmatpush.bf16.msra.mxu1 %v1390_v41  ;;  %606 = vmatpush.bf16.msra.mxu3 %v1655_v43  ;;  %v818_v13 = vrot.slane %v636_v54, 5  ;;  %v1663_v14 = vld [vmem:[#allocation8 + $0x40] sm:$0xff]  ;;  %v631_v16 = vor.u32 %v630_v60, %v627_v59  ;;  %v639_v17 = vor.u32 %v638_v0, %v635_v63  ;;  %v696_v19 = vor.u32 %v695_v1, %v694_v61  ;;  %v1677_v29 = vld [vmem:[#allocation8 + $0xb0] sm:$0xff]  ;;  %v1676_v31 = vld [vmem:[#allocation8 + $0xa8] sm:$0xff]  ;;  %s1374_s18 = sshll.u32 %s2236_s4, 4  ;;  %s1703_s21 = sshll.u32 %s2048_s27, 4 }
  0x52   : > { %557 = vmatpush.bf16.msra.mxu2 %v1394_v42  ;;  %v1667_v18 = vld [vmem:[#allocation8 + $0x60] sm:$0xff]  ;;  %v699_v20 = vor.u32 %v698_v4, %v697_v2  ;;  %v756_v21 = vor.u32 %v755_v5, %v754_v62  ;;  %v759_v22 = vor.u32 %v758_v7, %v757_v6  ;;  %vm693_vm3 = vsmask.f32 5376  ;;  %v1694_v38 = vld [vmem:[#allocation10 + $0x78] sm:$0xff]  ;;  %v1693_v40 = vld [vmem:[#allocation10 + $0x70] sm:$0xff]  ;;  %s414_s13 = scalar_lea.vmem [#allocation11], %s1374_s18  ;;  %s1209_s12 = scalar_lea.hbm %s2344_s7, %s1703_s21 }
  0x53   : > { %1431 = vmatmul.msk.bf16.vlgmr.msra.gmra.mxu0 %vm518_vm1, %v453_v46  ;;  %v1671_v23 = vld [vmem:[#allocation8 + $0x80] sm:$0xff]  ;;  %vm753_vm4 = vsmask.f32 4352  ;;  %v816_v24 = vor.u32 %v815_v11, %v814_v10  ;;  %v819_v25 = vor.u32 %v818_v13, %v817_v12  ;;  %vm813_vm5 = vsmask.f32 3328  ;;  %v1686_v39 = vld [vmem:[#allocation10 + $0x38] sm:$0xff] }
  0x54   : > { %672 = vmatpush.bf16.msrb.mxu0 %v1662_v44  ;;  %1432 = vmatmul.msk.bf16.vlgmr.msra.gmra.mxu1 %vm518_vm1, %v453_v46  ;;  %v640_v26 = vsel %vm624_vm2, %v631_v16, %v639_v17  ;;  %v700_v27 = vsel %vm693_vm3, %v696_v19, %v699_v20  ;;  %v760_v28 = vsel %vm753_vm4, %v756_v21, %v759_v22  ;;  %v1675_v32 = vld [vmem:[#allocation8 + $0xa0] sm:$0xff]  ;;  %v874_v33 = vrot.slane %v2262_v36, 6  ;;  %v1685_v41 = vld [vmem:[#allocation10 + $0x30] sm:$0xff]  ;;  %v1692_v42 = vld [vmem:[#allocation10 + $0x68] sm:$0xff]  ;;  %s1210_s2 = sshll.u32 %s414_s13, 4  ;;  %s1212_s3 = sshll.u32 %s1209_s12, 4  ;;  %s1211_s2 = int_to_ptr.vmem [resolvable:$true] %s1210_s2  ;;  %s1213_s3 = int_to_ptr.hbm [resolvable:$true] %s1212_s3 }
  0x55   : > { %732 = vmatpush.bf16.msrb.mxu1 %v1666_v45  ;;  %1433 = vmatmul.msk.bf16.vlgmr.msra.gmra.mxu2 %vm518_vm1, %v453_v46  ;;  %v820_v30 = vsel %vm813_vm5, %v816_v24, %v819_v25  ;;  %v875_v34 = vrot.slane %v2265_v37, 6  ;;  %v1684_v43 = vld [vmem:[#allocation10 + $0x28] sm:$0xff]  ;;  %v1702_v44 = vld [vmem:[#allocation10 + $0xb8] sm:$0xff]  ;;  %v1683_v37 = vld [vmem:[#allocation10 + $0x20] sm:$0xff]  ;;  %s1196_s27 = scalar_lea.sflag [#allocation4], %s2236_s4  ;;  %s1976_s28 = sshra.s32 %s1213_s3, 4  ;;  %s1977_s28 = int_to_ptr.hbm [resolvable:$true] %s1976_s28 }
  0x56   : > { %1450 = vmatmul.msk.bf16.vlgmr.msra.gmra.mxu3 %vm518_vm1, %v2262_v36  ;;  %792 = vmatpush.bf16.msrb.mxu2 %v1670_v47  ;;  %v1691_v36 = vld [vmem:[#allocation10 + $0x60] sm:$0xff]  ;;  %v1701_v45 = vld [vmem:[#allocation10 + $0xb0] sm:$0xff]  ;;  %v1690_v46 = vld [vmem:[#allocation10 + $0x58] sm:$0xff]  ;;  %s1978_s0 = scalar_lea.hbm %s1977_s28, 16  ;;  %s1982_s30 = scalar_lea.hbm %s2344_s7, 32 }
  0x57   : > { %852 = vmatpush.bf16.msrb.mxu3 %v1674_v48  ;;  %v876_v35 = vsel %vm873_vm6, %v874_v33, %v875_v34  ;;  %v1682_v47 = vld [vmem:[#allocation10 + $0x18] sm:$0xff]  ;;  %v1700_v48 = vld [vmem:[#allocation10 + $0xa8] sm:$0xff]  ;;  %v1699_v51 = vld [vmem:[#allocation10 + $0xa0] sm:$0xff]  ;;  %p1979_p1 = scmp.ne.s32.totalorder %s1977_s28, %s1978_s0  ;;  %p1983_p10 = scmp.lt.s32.totalorder %s1977_s28, %s2344_s7 }
  0x58   : > { %673 = vmatpush.bf16.msrb.mxu0 %v1661_v49  ;;  %v1689_v49 = vld [vmem:[#allocation10 + $0x50] sm:$0xff]  ;;  %v1688_v53 = vld [vmem:[#allocation10 + $0x48] sm:$0xff]  ;;  %v1695_v2 = vld [vmem:[#allocation10 + $0x80] sm:$0xff]  ;;  %p1984_p12 = scmp.lt.s32.totalorder %s1982_s30, %s1978_s0 }
  0x59   : > { %733 = vmatpush.bf16.msrb.mxu1 %v1665_v50  ;;  %v1681_v50 = vld [vmem:[#allocation10 + $0x10] sm:$0xff]  ;;  %v1696_v0 = vld [vmem:[#allocation10 + $0x88] sm:$0xff]  ;;  %v1808_v13 = vld [vmem:[%s2342_s5] ss:$0 sm:$0xff]  ;;  %p1980_p4 = pnand %p1979_p1, %p2198_p3 }
  0x5a   : > { %793 = vmatpush.bf16.msrb.mxu2 %v1669_v55  ;;  %v1680_v55 = vld [vmem:[#allocation10 + $0x8] sm:$0xff]  ;;  %v1697_v60 = vld [vmem:[#allocation10 + $0x90] sm:$0xff]  ;;  %v1810_v33 = vld [vmem:[%s2342_s5 + $0x2] ss:$0 sm:$0xff]  ;;  %p1985_p13 = por %p1984_p12, %p1983_p10 }
  0x5b   : > { %853 = vmatpush.bf16.msrb.mxu3 %v1673_v56  ;;  %v1698_v56 = vld [vmem:[#allocation10 + $0x98] sm:$0xff]  ;;  %p1981_p8 = pneg %p1980_p4 }
  0x5c   : > { %674 = vmatpush.bf16.msrb.mxu0 %v1660_v57  ;;  %v1687_v57 = vld [vmem:[#allocation10 + $0x40] sm:$0xff] }
  0x5d   : > { %734 = vmatpush.bf16.msrb.mxu1 %v1664_v58  ;;  %v1679_v58 = vld [vmem:[#allocation10] sm:$0xff]  ;;  %p1986_p0 = pnand %p1985_p13, %p1981_p8 }
  0x5e   : > { %794 = vmatpush.bf16.msrb.mxu2 %v1668_v3 }
  0x5f   : > { %854 = vmatpush.bf16.msrb.mxu3 %v1672_v8 }
  0x60   : > { %675 = vmatpush.bf16.msrb.mxu0 %v1659_v9 }
  0x61   : > { %735 = vmatpush.bf16.msrb.mxu1 %v1663_v14 }
  0x62   : > { %795 = vmatpush.bf16.msrb.mxu2 %v1667_v18 }
  0x63   : > { %855 = vmatpush.bf16.msrb.mxu3 %v1671_v23  ;;  %1467 = vmatmul.msk.bf16.vlgmr.msrb.gmra.mxu0 %vm518_vm1, %v640_v26 }
  0x64   : > { %908 = vmatpush.bf16.msra.mxu0 %v1678_v15  ;;  %1484 = vmatmul.msk.bf16.vlgmr.msrb.gmra.mxu1 %vm518_vm1, %v700_v27  ;;  %v1809_v15 = vld [vmem:[%s2342_s5 + $0x1] ss:$0 sm:$0xff] }
  0x65   : > { %1501 = vmatmul.msk.bf16.vlgmr.msrb.gmra.mxu2 %vm518_vm1, %v760_v28  ;;  %1020 = vmatpush.bf16.msra.mxu1 %v1694_v38 }
  0x66   : > { %1518 = vmatmul.msk.bf16.vlgmr.msrb.gmra.mxu3 %vm518_vm1, %v820_v30  ;;  %1082 = vmatpush.bf16.msra.mxu2 %v1686_v39 }
  0x67   : > { %1171 = vmatpush.bf16.msra.mxu3 %v1702_v44 }
  0x68   : > { %909 = vmatpush.bf16.msra.mxu0 %v1677_v29 }
  0x69   : > { %1021 = vmatpush.bf16.msra.mxu1 %v1693_v40 }
  0x6a   : > { %1083 = vmatpush.bf16.msra.mxu2 %v1685_v41 }
  0x6b   : > { %1172 = vmatpush.bf16.msra.mxu3 %v1701_v45 }
  0x6c   : > { %910 = vmatpush.bf16.msra.mxu0 %v1676_v31 }
  0x6d   : > { %1022 = vmatpush.bf16.msra.mxu1 %v1692_v42 }
  0x6e   : > { %1084 = vmatpush.bf16.msra.mxu2 %v1684_v43 }
  0x6f   : > { %1173 = vmatpush.bf16.msra.mxu3 %v1700_v48 }
  0x70   : > { %911 = vmatpush.bf16.msra.mxu0 %v1675_v32 }
  0x71   : > { %1023 = vmatpush.bf16.msra.mxu1 %v1691_v36 }
  0x72   : > { %1085 = vmatpush.bf16.msra.mxu2 %v1683_v37 }
  0x73   : > { %1535 = vmatmul.msk.bf16.vlgmr.msra.gmra.mxu0 %vm518_vm1, %v876_v35  ;;  %1174 = vmatpush.bf16.msra.mxu3 %v1699_v51 }
  0x75   : > { %1024 = vmatpush.bf16.msra.mxu1 %v1690_v46 }
  0x76   : > { %1086 = vmatpush.bf16.msra.mxu2 %v1682_v47  ;;  %v1811_v47 = vld [vmem:[%s2343_s6] ss:$0 sm:$0xff] }
  0x77   : > { %1175 = vmatpush.bf16.msra.mxu3 %v1698_v56 }
  0x79   : > { %1025 = vmatpush.bf16.msra.mxu1 %v1689_v49 }
  0x7a   : > { %1087 = vmatpush.bf16.msra.mxu2 %v1681_v50 }
  0x7b   : > { %1176 = vmatpush.bf16.msra.mxu3 %v1697_v60 }
  0x7d   : > { %1026 = vmatpush.bf16.msra.mxu1 %v1688_v53 }
  0x7e   : > { %1088 = vmatpush.bf16.msra.mxu2 %v1680_v55 }
  0x7f   : > { %1177 = vmatpush.bf16.msra.mxu3 %v1696_v0 }
  0x81   : > { %1027 = vmatpush.bf16.msra.mxu1 %v1687_v57 }
  0x82   : > { %1089 = vmatpush.bf16.msra.mxu2 %v1679_v58 }
  0x83   : > { %1178 = vmatpush.bf16.msra.mxu3 %v1695_v2 }
  0xd0   : > { %v531_v52 = vpop.f32.mrf.mxu0 }
  0xd1   : > { %v545_v54 = vpop.f32.mrf.mxu1 }
  0xd8   : > { %v559_v59 = vpop.f32.mrf.mxu2  ;;  %v533_v62 = vpop.f32.mrf.mxu0 }
  0xd9   : > { %v608_v61 = vpop.f32.mrf.mxu3  ;;  %v547_v63 = vpop.f32.mrf.mxu1 }
  0xda   : > { %v613_v26 = vadd.f32 %v608_v61, %v559_v59 }
  0xe0   : > { %v561_v1 = vpop.f32.mrf.mxu2  ;;  %v677_v4 = vpop.f32.mrf.mxu0 }
  0xe1   : > { %v610_v3 = vpop.f32.mrf.mxu3  ;;  %v737_v5 = vpop.f32.mrf.mxu1  ;;  %v682_v10 = vadd.f32 %v677_v4, %v545_v54 }
  0xe2   : > { %v742_v9 = vadd.f32 %v737_v5, %v531_v52  ;;  %v614_v35 = vadd.f32 %v610_v3, %v561_v1 }
  0xe8   : > { %v797_v6 = vpop.f32.mrf.mxu2  ;;  %v679_v8 = vpop.f32.mrf.mxu0 }
  0xe9   : > { %v857_v7 = vpop.f32.mrf.mxu3  ;;  %v739_v11 = vpop.f32.mrf.mxu1  ;;  %v802_v12 = vadd.f32 %v797_v6, %v742_v9  ;;  %v683_v17 = vadd.f32 %v679_v8, %v547_v63 }
  0xea   : > { %v862_v14 = vadd.f32 %v857_v7, %v682_v10  ;;  %v743_v16 = vadd.f32 %v739_v11, %v533_v62 }
  0xeb   : > { %v924_v19 = vadd.f32 %v1808_v13, %v802_v12 }
  0xec   : > { %v950_v23 = vadd.f32 %v1809_v15, %v862_v14 }
  0xed   : > { %v926_v28 = vmax.f32 %v924_v19, 0.0 }
  0xee   : > { %v952_v30 = vmax.f32 %v950_v23, 0.0 }
  0xf0   : > { %v799_v18 = vpop.f32.mrf.mxu2  ;;  %v913_v22 = vpop.f32.mrf.mxu0 }
  0xf1   : > { %v803_v20 = vadd.f32 %v799_v18, %v743_v16  ;;  %v859_v21 = vpop.f32.mrf.mxu3  ;;  %v918_v32 = vadd.f32 %v913_v22, %v613_v26 }
  0xf2   : > { %v863_v24 = vadd.f32 %v859_v21, %v683_v17 }
  0xf3   : > { %v925_v25 = vadd.f32 %v1808_v13, %v803_v20  ;;  %v1101_v40 = vadd.f32 %v1810_v33, %v918_v32 }
  0xf4   : > { %v951_v27 = vadd.f32 %v1809_v15, %v863_v24 }
  0xf5   : > { %v927_v29 = vmax.f32 %v925_v25, 0.0  ;;  %v1103_v43 = vmax.f32 %v1101_v40, 0.0 }
  0xf6   : > { %v953_v31 = vmax.f32 %v951_v27, 0.0 }
  0xf7   : > { %v928_v34 = vpack.c.bf16 %v927_v29, %v926_v28 }
  0xf8   : > { %v954_v38 = vpack.c.bf16 %v953_v31, %v952_v30  ;;  %v915_v39 = vpop.f32.mrf.mxu0 }
  0xf9   : > { %1090 = vmatmul.bf16.vlgmr.msra.gmra.mxu2 %v928_v34  ;;  %v919_v41 = vadd.f32 %v915_v39, %v614_v35 }
  0xfa   : > { %1028 = vmatmul.bf16.vlgmr.msra.gmra.mxu1 %v954_v38 }
  0xfb   : > { %v1102_v42 = vadd.f32 %v1810_v33, %v919_v41 }
  0xfd   : > { %v1104_v44 = vmax.f32 %v1102_v42, 0.0 }
  0xff   : > { %v1105_v36 = vpack.c.bf16 %v1104_v44, %v1103_v43 }
 0x101   : > { %1179 = vmatmul.bf16.vlgmr.msra.gmra.mxu3 %v1105_v36 }
 0x177   : > { %v1029_v45 = vpop.f32.mrf.mxu1 }
 0x17c   : > { %v1091_v37 = vpop.f32.mrf.mxu2 }
 0x17d   : > { %v1092_v46 = vadd.f32 %v1091_v37, %v1029_v45 }
 0x17f   : > { %v1031_v52 = vpop.f32.mrf.mxu1 }
 0x184   : > { %v1180_v48 = vpop.f32.mrf.mxu3  ;;  %v1093_v51 = vpop.f32.mrf.mxu2 }
 0x185   : > { %v1185_v49 = vadd.f32 %v1180_v48, %v1092_v46  ;;  %v1094_v53 = vadd.f32 %v1093_v51, %v1031_v52 }
 0x187   : > { %v1191_v50 = vadd.f32 %v1811_v47, %v1185_v49 }
 0x189   : > { %1193 = vst [vmem:[%s414_s13] sm:$0xff] %v1191_v50 }
 0x18c   : > { %v1182_v54 = vpop.f32.mrf.mxu3 }
 0x18d   : > { %v1186_v55 = vadd.f32 %v1182_v54, %v1094_v53 }
 0x18f   : > { %v1192_v56 = vadd.f32 %v1811_v47, %v1186_v55 }
 0x191   : > { %1194 = vst [vmem:[%s414_s13 + $0x8] sm:$0xff] %v1192_v56 }
 0x192   : > { %1989 = shalt.err (!%p1986_p0)
}
 0x193   : > { %s2065_s4 = smov 128   ;;  %s2066_s17 = smov 8  }
 0x194   : > { %1720 = dma.vmem_to_hbm [thread:$0]  (%p2198_p3), %s1211_s2, 256, %s1213_s3, %s1196_s27, %s2065_s4, %s2065_s4, %s2066_s17  }
 0x195 PF: > { %s1227_s23 = sand.u32 1, %s2036_s24   ;;  %p1740_p5 = pnand %p1361_p11, %p2152_p6 }
 0x196   : > { %s1228_s15 = scalar_lea.sflag [#allocation4], %s1227_s23 }
 0x197   : > { %p1741_p7 = pneg %p1740_p5 }
 0x199   : > { %2031 = dma.done.wait (%p1741_p7), %s1228_s15, 256  }
 0x19a   : > { %2033 = vsyncadd (%p1741_p7), %s1228_s15, 4294967040  ;;  %s27_s29 = sadd.s32 1, %s2056_s29   ;;  %s2372_s18 = sld [smem:[#allocation17_spill]] }
 0x19b   : > { %p24_p9 = scmp.ge.s32.totalorder %s27_s29, 4   ;;  %s2373_s26 = sld [smem:[#allocation20_spill]] }
 0x19c   : > { %s2374_s27 = sld [smem:[#allocation18_spill]]  ;;  %s2376_s24 = smov %s2040_s25 }
 0x19d   : > { %s2375_s28 = sld [smem:[#allocation19_spill]]  ;;  %26 = sbr.rel (!%p24_p9) target bundleno = 14 (0xe), region = 127 }
 0x1a0   : > { %s2377_s25 = smov %s2372_s18 }
 0x1a2   :  { %1234 = vsyncpa [#allocation3], 1 }
 0x1a3   :  { %1236 = vsyncpa [#allocation3 + $0x1], 1 }
 0x1a4   :  { %1237 = vsyncpa [#allocation6], 1 }
 0x1a5   :  { %1239 = vsyncpa [#allocation6 + $0x1], 1 }
 0x1a6   :  { %1240 = vsyncpa [#allocation9], 1 }
 0x1a7   :  { %1241 = vsyncpa [#allocation4], 1 }
 0x1a8   :  { %1243 = vsyncpa [#allocation4 + $0x1], 1 }

</bundles_post_ra>
